<compile_context>
chip_gen: v6e
topology: v6e:2x2x1
jax: 0.10.0
libtpu: 0.0.40
codegen_flags: <defaults>
</compile_context>

<pallas_src>
import functools

import jax
import jax.numpy as jnp
from jax.experimental import pallas as pl
from jax.experimental.pallas import tpu as pltpu

BN_EPS = 1e-5
VMEM_LIMIT = 32 * 1024 * 1024  # explicit scoped-VMEM budget (safe on v5e/v6e/v7x)


def _vmem_spec():
    return pl.BlockSpec(memory_space=pltpu.MemorySpace.VMEM)


def _pick_tile(dim, preferred):
    """Largest power-of-two tile <= preferred that divides dim (>=128), else full dim."""
    t = preferred
    while t >= 128:
        if dim % t == 0:
            return t
        t //= 2
    return dim


def _pick_row_tile(rows, preferred=512):
    t = preferred
    while t >= 8:
        if rows % t == 0:
            return t
        t //= 2
    return rows


# ----------------------------------------------------------------------------
# Tiled fused Linear (+ optional per-view BatchNorm, + optional ReLU) kernel
# grid = (num_views, OUT // tn, K // tk); reduction (K) axis is last.
# ----------------------------------------------------------------------------
def _linear_bn_relu_kernel(*refs, use_bn, affine, relu):
    if affine:
        x_ref, w_ref, g_ref, b_ref, o_ref, acc_ref = refs
    else:
        x_ref, w_ref, o_ref, acc_ref = refs
        g_ref = b_ref = None

    k_idx = pl.program_id(2)

    @pl.when(k_idx == 0)
    def _():
        acc_ref[...] = jnp.zeros_like(acc_ref)

    # bf16 x bf16 -> f32 accumulate on the MXU, no in-kernel transpose.
    acc_ref[...] += jax.lax.dot_general(
        x_ref[...], w_ref[...],
        dimension_numbers=(((1,), (0,)), ((), ())),
        preferred_element_type=jnp.float32,
    )

    @pl.when(k_idx == pl.num_programs(2) - 1)
    def _():
        h = acc_ref[...]                      # (rows_per_view, tn) f32
        if use_bn:
            # Block holds exactly one view's rows -> per-view batch statistics.
            mean = jnp.mean(h, axis=0, keepdims=True)
            var = jnp.mean((h - mean) ** 2, axis=0, keepdims=True)
            h = (h - mean) * jax.lax.rsqrt(var + BN_EPS)
            if affine:
                h = h * g_ref[...] + b_ref[...]
        if relu:
            h = jnp.maximum(h, 0.0)
        o_ref[...] = h.astype(o_ref.dtype)


def linear_layer(x, w_t, gamma=None, beta=None, *, use_bn, affine, relu,
                 out_dtype=jnp.float32):
    """x: (V, N, K), w_t: (K, OUT) f32 (pre-transposed). Returns (V, N, OUT) out_dtype."""
    v, n, k_in = x.shape
    k_w, out = w_t.shape
    assert k_in == k_w

    tk = _pick_tile(k_in, 512)
    tn = _pick_tile(out, 256)
    grid = (v, out // tn, k_in // tk)

    # bf16 at the kernel boundary: halves HBM traffic + VMEM tiles, 2x MXU rate.
    # (No-op when the producing layer already emitted bf16.)
    x_bf = x.astype(jnp.bfloat16)
    w_bf = w_t.astype(jnp.bfloat16)

    in_specs = [
        pl.BlockSpec((None, n, tk), lambda vi, j, ki: (vi, 0, ki)),
        pl.BlockSpec((tk, tn), lambda vi, j, ki: (ki, j)),
    ]
    args = [x_bf, w_bf]

    has_affine = bool(use_bn and affine)
    if has_affine:
        in_specs += [
            pl.BlockSpec((1, tn), lambda vi, j, ki: (0, j)),
            pl.BlockSpec((1, tn), lambda vi, j, ki: (0, j)),
        ]
        args += [gamma, beta]

    kern = functools.partial(
        _linear_bn_relu_kernel, use_bn=use_bn, affine=has_affine, relu=relu
    )

    out_itemsize = jnp.dtype(out_dtype).itemsize
    flops = 2 * v * n * k_in * out
    bytes_accessed = (
        x_bf.size * 2 * (out // tn)     # x re-read per output tile
        + w_bf.size * 2 * v             # weights re-read per view
        + v * n * out * out_itemsize    # output
    )

    return pl.pallas_call(
        kern,
        out_shape=jax.ShapeDtypeStruct((v, n, out), out_dtype),
        grid_spec=pltpu.PrefetchScalarGridSpec(
            num_scalar_prefetch=0,
            grid=grid,
            in_specs=in_specs,
            out_specs=pl.BlockSpec((None, n, tn), lambda vi, j, ki: (vi, 0, j)),
            scratch_shapes=[pltpu.VMEM((n, tn), jnp.float32)],
        ),
        compiler_params=pltpu.CompilerParams(
            dimension_semantics=("parallel", "parallel", "arbitrary"),
            vmem_limit_bytes=VMEM_LIMIT,
        ),
        cost_estimate=pl.CostEstimate(
            flops=flops, transcendentals=0, bytes_accessed=bytes_accessed
        ),
    )(*args)


# ----------------------------------------------------------------------------
# Contrastive loss kernel (both view pairs in a single call, batched over views):
#   view 0 : (q1, k2)     view 1 : (q2, k1)
#   normalize (rsqrt), logits = qn @ kn^T / T per view, CE against the diagonal,
#   loss = 2T * (CE_view0 + CE_view1) / N.
# ----------------------------------------------------------------------------
def _contrastive_loss_kernel(q_ref, k_ref, o_ref, *, temperature, rows_per_view):
    q = q_ref[...].astype(jnp.float32)       # (2, N, D)
    k = k_ref[...].astype(jnp.float32)       # (2, N, D)
    inv_t = 1.0 / temperature

    qn = q * jax.lax.rsqrt(jnp.sum(q * q, axis=-1, keepdims=True) + 1e-24)
    kn = k * jax.lax.rsqrt(jnp.sum(k * k, axis=-1, keepdims=True) + 1e-24)

    # diagonal logits directly from paired rows (no masked full-row sums)
    diag = jnp.sum(qn * kn, axis=-1, keepdims=True) * inv_t            # (2, N, 1)

    logits = jnp.einsum(
        "vnc,vmc->vnm", qn, kn, preferred_element_type=jnp.float32
    ) * inv_t                                                           # (2, N, N)

    mx = jnp.max(logits, axis=-1, keepdims=True)                        # (2, N, 1)
    lse = mx + jnp.log(jnp.sum(jnp.exp(logits - mx), axis=-1, keepdims=True))

    per_row = lse - diag                                                # (2, N, 1)
    per_view = jnp.sum(per_row, axis=1, keepdims=True)                  # (2, 1, 1)
    total = jnp.sum(per_view, axis=0, keepdims=True)                    # (1, 1, 1)

    # sum of the two per-view mean cross-entropies, each scaled by 2*T
    o_ref[...] = total * (2.0 * temperature / float(rows_per_view))


def contrastive_loss(q_pair, k_pair, temperature, rows_per_view):
    kern = functools.partial(
        _contrastive_loss_kernel,
        temperature=float(temperature),
        rows_per_view=int(rows_per_view),
    )
    out = pl.pallas_call(
        kern,
        out_shape=jax.ShapeDtypeStruct((1, 1, 1), jnp.float32),
        in_specs=[_vmem_spec(), _vmem_spec()],
        out_specs=_vmem_spec(),
        compiler_params=pltpu.CompilerParams(vmem_limit_bytes=VMEM_LIMIT),
    )(q_pair, k_pair)
    return out[0, 0, 0]


# ----------------------------------------------------------------------------
# Momentum (EMA) update kernel: param_m = m * param_m + (1 - m) * param_b
# Tiled over rows, lane-dense blocks, in-place via input_output_aliases.
# ----------------------------------------------------------------------------
def _ema_kernel(pm_ref, pb_ref, o_ref, *, m):
    o_ref[...] = pm_ref[...] * m + pb_ref[...] * (1.0 - m)


def ema_update(param_m, param_b, m):
    rows, cols = param_m.shape
    tm = _pick_row_tile(rows, 512)
    grid = (rows // tm,)
    return pl.pallas_call(
        functools.partial(_ema_kernel, m=float(m)),
        out_shape=jax.ShapeDtypeStruct(param_m.shape, param_m.dtype),
        grid=grid,
        in_specs=[
            pl.BlockSpec((tm, cols), lambda i: (i, 0)),
            pl.BlockSpec((tm, cols), lambda i: (i, 0)),
        ],
        out_specs=pl.BlockSpec((tm, cols), lambda i: (i, 0)),
        input_output_aliases={0: 0},
        compiler_params=pltpu.CompilerParams(
            dimension_semantics=("parallel",),
            vmem_limit_bytes=VMEM_LIMIT,
        ),
        cost_estimate=pl.CostEstimate(
            flops=3 * rows * cols,
            transcendentals=0,
            bytes_accessed=3 * rows * cols * 4,
        ),
    )(param_m, param_b)


# ----------------------------------------------------------------------------
# Model pieces (glue in plain JAX, compute in Pallas kernels above)
# Weights are stored pre-transposed as (in_features, out_features).
# ----------------------------------------------------------------------------
def encoder_forward(x_all, p):
    # x_all: (2, N, F)
    h = linear_layer(x_all, p["w1"], p["g1"], p["b1"],
                     use_bn=True, affine=True, relu=True,
                     out_dtype=jnp.bfloat16)                 # bf16 hidden, feeds layer 2
    z = linear_layer(h, p["w2"],
                     use_bn=True, affine=False, relu=False)  # last BN, affine=False, f32
    return z


def predictor_forward(z, p):
    h = linear_layer(z, p["wp1"], p["gp1"], p["bp1"],
                     use_bn=True, affine=True, relu=True,
                     out_dtype=jnp.bfloat16)
    q = linear_layer(h, p["wp2"],
                     use_bn=False, affine=False, relu=False)  # no BN after predictor, f32
    return q


def moco_forward(base_params, momentum_params, pred_params, x1, x2, *, m, temperature):
    n = x1.shape[0]
    # Fuse both augmented views into one (2, N, F) bf16 batch; the cast is done once
    # and reused by both the base-encoder and momentum-encoder branches.
    x_all = jnp.stack([x1.reshape(n, -1), x2.reshape(n, -1)], axis=0).astype(jnp.bfloat16)

    # query branch (base encoder + predictor) for both views in one pass
    q_all = predictor_forward(encoder_forward(x_all, base_params), pred_params)  # (2,N,dim)

    # momentum update of the momentum encoder (Pallas EMA kernels), then key branch
    new_momentum = {key: ema_update(momentum_params[key], base_params[key], m)
                    for key in momentum_params}
    k_all = encoder_forward(x_all, new_momentum)                                  # (2,N,dim)

    # concat_all_gather == identity on a single device; rank == 0
    q_pair = q_all           # (2, N, dim): [q1, q2]
    k_pair = k_all[::-1]     # (2, N, dim): [k2, k1]  -> pairs (q1,k2), (q2,k1)
    loss = contrastive_loss(q_pair, k_pair, temperature, rows_per_view=n)
    return loss, new_momentum


def init_params(key, in_features, dim, mlp_dim):
    k1, k2, k3, k4 = jax.random.split(key, 4)
    scale = 0.02
    enc = {
        "w1": scale * jax.random.normal(k1, (in_features, mlp_dim), jnp.float32),
        "g1": jnp.ones((1, mlp_dim), jnp.float32),
        "b1": jnp.zeros((1, mlp_dim), jnp.float32),
        "w2": scale * jax.random.normal(k2, (mlp_dim, dim), jnp.float32),
    }
    pred = {
        "wp1": scale * jax.random.normal(k3, (dim, mlp_dim), jnp.float32),
        "gp1": jnp.ones((1, mlp_dim), jnp.float32),
        "bp1": jnp.zeros((1, mlp_dim), jnp.float32),
        "wp2": scale * jax.random.normal(k4, (mlp_dim, dim), jnp.float32),
    }
    return enc, pred


if __name__ == "__main__":
    # small, deterministic example shapes
    batch, channels, spatial = 2, 4, 16
    dim, mlp_dim, T = 32, 64, 1.0
    in_features = channels * spatial * spatial

    key = jax.random.PRNGKey(0)
    kx1, kx2, kp = jax.random.split(key, 3)
    x1 = jax.random.normal(kx1, (batch, channels, spatial, spatial), jnp.float32)
    x2 = jax.random.normal(kx2, (batch, channels, spatial, spatial), jnp.float32)

    base_params, pred_params = init_params(kp, in_features, dim, mlp_dim)
    # momentum encoder initialised as an exact copy of the base encoder
    momentum_params = {k: v for k, v in base_params.items()}

    m = 0.99  # moco momentum

    fwd = jax.jit(functools.partial(moco_forward, m=m, temperature=T))
    loss, new_momentum = fwd(base_params, momentum_params, pred_params, x1, x2)
    jax.block_until_ready((loss, new_momentum))
    print("KERNEL_OK")
</pallas_src>

<mosaic_0001>
module attributes {stable_mosaic.version = 11 : i64} {
  func.func @_ema_kernel(%arg0: i32, %arg1: memref<512x64xf32, #tpu.memory_space<vmem>>, %arg2: memref<512x64xf32, #tpu.memory_space<vmem>>, %arg3: memref<512x64xf32, #tpu.memory_space<vmem>>) attributes {dimension_semantics = [#tpu.dimension_semantics<parallel>], iteration_bounds = array<i64: 2>, scalar_prefetch = 0 : i64, scratch_operands = 0 : i64, tpu.core_type = #tpu.core_type<tc>, window_params = [{transform_indices = @transform_0, window_bounds = array<i64: 512, 64>}, {transform_indices = @transform_1, window_bounds = array<i64: 512, 64>}, {transform_indices = @transform_2, window_bounds = array<i64: 512, 64>}]} {
    %c0 = arith.constant 0 : index
    %c0_0 = arith.constant 0 : index
    %0 = vector.load %arg1[%c0, %c0_0] : memref<512x64xf32, #tpu.memory_space<vmem>>, vector<512x64xf32>
    %cst = arith.constant 9.900000e-01 : f32
    %1 = vector.broadcast %cst : f32 to vector<512x64xf32>
    %2 = arith.mulf %0, %1 : vector<512x64xf32>
    %c0_1 = arith.constant 0 : index
    %c0_2 = arith.constant 0 : index
    %3 = vector.load %arg2[%c0_1, %c0_2] : memref<512x64xf32, #tpu.memory_space<vmem>>, vector<512x64xf32>
    %cst_3 = arith.constant 0.00999999977 : f32
    %4 = vector.broadcast %cst_3 : f32 to vector<512x64xf32>
    %5 = arith.mulf %3, %4 : vector<512x64xf32>
    %6 = arith.addf %2, %5 : vector<512x64xf32>
    %c0_4 = arith.constant 0 : index
    %c0_5 = arith.constant 0 : index
    %7 = vector.load %arg3[%c0_4, %c0_5] : memref<512x64xf32, #tpu.memory_space<vmem>>, vector<512x64xf32>
    tpu.vector_store %arg3[%c0_4, %c0_5], %6 {strides = array<i32>} : memref<512x64xf32, #tpu.memory_space<vmem>>, vector<512x64xf32>,
    return
  }
  func.func @transform_0(%arg0: i32) -> (i32, i32) {
    %c0_i32 = arith.constant 0 : i32
    %c0_i32_0 = arith.constant 0 : i32
    return %arg0, %c0_i32 : i32, i32
  }
  func.func @transform_1(%arg0: i32) -> (i32, i32) {
    %c0_i32 = arith.constant 0 : i32
    %c0_i32_0 = arith.constant 0 : i32
    return %arg0, %c0_i32 : i32, i32
  }
  func.func @transform_2(%arg0: i32) -> (i32, i32) {
    %c0_i32 = arith.constant 0 : i32
    %c0_i32_0 = arith.constant 0 : i32
    return %arg0, %c0_i32 : i32, i32
  }
}

module attributes {stable_mosaic.version = 11 : i64} {
  func.func @_ema_kernel(%arg0: i32, %arg1: memref<1x64xf32, #tpu.memory_space<vmem>>, %arg2: memref<1x64xf32, #tpu.memory_space<vmem>>, %arg3: memref<1x64xf32, #tpu.memory_space<vmem>>) attributes {dimension_semantics = [#tpu.dimension_semantics<parallel>], iteration_bounds = array<i64: 1>, scalar_prefetch = 0 : i64, scratch_operands = 0 : i64, tpu.core_type = #tpu.core_type<tc>, window_params = [{transform_indices = @transform_0, window_bounds = array<i64: 1, 64>}, {transform_indices = @transform_1, window_bounds = array<i64: 1, 64>}, {transform_indices = @transform_2, window_bounds = array<i64: 1, 64>}]} {
    %c0 = arith.constant 0 : index
    %c0_0 = arith.constant 0 : index
    %0 = vector.load %arg1[%c0, %c0_0] : memref<1x64xf32, #tpu.memory_space<vmem>>, vector<1x64xf32>
    %cst = arith.constant 9.900000e-01 : f32
    %1 = vector.broadcast %cst : f32 to vector<1x64xf32>
    %2 = arith.mulf %0, %1 : vector<1x64xf32>
    %c0_1 = arith.constant 0 : index
    %c0_2 = arith.constant 0 : index
    %3 = vector.load %arg2[%c0_1, %c0_2] : memref<1x64xf32, #tpu.memory_space<vmem>>, vector<1x64xf32>
    %cst_3 = arith.constant 0.00999999977 : f32
    %4 = vector.broadcast %cst_3 : f32 to vector<1x64xf32>
    %5 = arith.mulf %3, %4 : vector<1x64xf32>
    %6 = arith.addf %2, %5 : vector<1x64xf32>
    %c0_4 = arith.constant 0 : index
    %c0_5 = arith.constant 0 : index
    %7 = vector.load %arg3[%c0_4, %c0_5] : memref<1x64xf32, #tpu.memory_space<vmem>>, vector<1x64xf32>
    tpu.vector_store %arg3[%c0_4, %c0_5], %6 {strides = array<i32>} : memref<1x64xf32, #tpu.memory_space<vmem>>, vector<1x64xf32>,
    return
  }
  func.func @transform_0(%arg0: i32) -> (i32, i32) {
    %c0_i32 = arith.constant 0 : i32
    %c0_i32_0 = arith.constant 0 : i32
    return %arg0, %c0_i32 : i32, i32
  }
  func.func @transform_1(%arg0: i32) -> (i32, i32) {
    %c0_i32 = arith.constant 0 : i32
    %c0_i32_0 = arith.constant 0 : i32
    return %arg0, %c0_i32 : i32, i32
  }
  func.func @transform_2(%arg0: i32) -> (i32, i32) {
    %c0_i32 = arith.constant 0 : i32
    %c0_i32_0 = arith.constant 0 : i32
    return %arg0, %c0_i32 : i32, i32
  }
}

module attributes {stable_mosaic.version = 11 : i64} {
  func.func @_linear_bn_relu_kernel(%arg0: i32, %arg1: i32, %arg2: i32, %arg3: memref<1x2x512xbf16, #tpu.memory_space<vmem>>, %arg4: memref<512x64xbf16, #tpu.memory_space<vmem>>, %arg5: memref<1x64xf32, #tpu.memory_space<vmem>>, %arg6: memref<1x64xf32, #tpu.memory_space<vmem>>, %arg7: memref<1x2x64xbf16, #tpu.memory_space<vmem>>, %arg8: memref<2x64xf32, #tpu.memory_space<vmem>>) attributes {dimension_semantics = [#tpu.dimension_semantics<parallel>, #tpu.dimension_semantics<parallel>, #tpu.dimension_semantics<arbitrary>], iteration_bounds = array<i64: 2, 1, 2>, scalar_prefetch = 0 : i64, scratch_operands = 1 : i64, tpu.core_type = #tpu.core_type<tc>, window_params = [{transform_indices = @transform_0, window_bounds = array<i64: 1, 2, 512>}, {transform_indices = @transform_1, window_bounds = array<i64: 512, 64>}, {transform_indices = @transform_2, window_bounds = array<i64: 1, 64>}, {transform_indices = @transform_3, window_bounds = array<i64: 1, 64>}, {transform_indices = @transform_4, window_bounds = array<i64: 1, 2, 64>}]} {
    %c0_i32 = arith.constant 0 : i32
    %0 = arith.cmpi eq, %arg2, %c0_i32 : i32
    %1 = arith.extui %0 : i1 to i32
    %c0_i32_0 = arith.constant 0 : i32
    %2 = arith.cmpi ne, %1, %c0_i32_0 : i32
    scf.if %2 {
      %cst_10 = arith.constant 0.000000e+00 : f32
      %13 = vector.broadcast %cst_10 : f32 to vector<2x64xf32>
      %c0_11 = arith.constant 0 : index
      %c0_12 = arith.constant 0 : index
      %14 = vector.load %arg8[%c0_11, %c0_12] : memref<2x64xf32, #tpu.memory_space<vmem>>, vector<2x64xf32>
      tpu.vector_store %arg8[%c0_11, %c0_12], %13 {strides = array<i32>} : memref<2x64xf32, #tpu.memory_space<vmem>>, vector<2x64xf32>,
    } else {
    }
    %c0 = arith.constant 0 : index
    %c0_1 = arith.constant 0 : index
    %3 = vector.load %arg8[%c0, %c0_1] : memref<2x64xf32, #tpu.memory_space<vmem>>, vector<2x64xf32>
    %c0_2 = arith.constant 0 : index
    %c0_3 = arith.constant 0 : index
    %c0_4 = arith.constant 0 : index
    %4 = vector.load %arg3[%c0_2, %c0_3, %c0_4] : memref<1x2x512xbf16, #tpu.memory_space<vmem>>, vector<1x2x512xbf16>
    %5 = vector.shape_cast %4 : vector<1x2x512xbf16> to vector<2x512xbf16>
    %c0_5 = arith.constant 0 : index
    %c0_6 = arith.constant 0 : index
    %6 = vector.load %arg4[%c0_5, %c0_6] : memref<512x64xbf16, #tpu.memory_space<vmem>>, vector<512x64xbf16>
    %cst = arith.constant dense<0.000000e+00> : vector<2x64xf32>
    %7 = tpu.matmul %5, %6, %cst {dimension_numbers = #tpu.dot_dimension_numbers<[1], [0], [0], [1], [0, 0, 1, 1], [], []>} : vector<2x512xbf16>, vector<512x64xbf16>, vector<2x64xf32> -> vector<2x64xf32>
    %8 = arith.addf %3, %7 : vector<2x64xf32>
    %c0_7 = arith.constant 0 : index
    %c0_8 = arith.constant 0 : index
    %9 = vector.load %arg8[%c0_7, %c0_8] : memref<2x64xf32, #tpu.memory_space<vmem>>, vector<2x64xf32>
    tpu.vector_store %arg8[%c0_7, %c0_8], %8 {strides = array<i32>} : memref<2x64xf32, #tpu.memory_space<vmem>>, vector<2x64xf32>,
    %c1_i32 = arith.constant 1 : i32
    %10 = arith.cmpi eq, %arg2, %c1_i32 : i32
    %11 = arith.extui %10 : i1 to i32
    %c0_i32_9 = arith.constant 0 : i32
    %12 = arith.cmpi ne, %11, %c0_i32_9 : i32
    scf.if %12 {
      %c0_10 = arith.constant 0 : index
      %c0_11 = arith.constant 0 : index
      %13 = vector.load %arg8[%c0_10, %c0_11] : memref<2x64xf32, #tpu.memory_space<vmem>>, vector<2x64xf32>
      %cst_12 = arith.constant dense<0.000000e+00> : vector<64xf32>
      %14 = vector.multi_reduction <add>, %13, %cst_12 [0] : vector<2x64xf32> to vector<64xf32>
      %15 = vector.shape_cast %14 : vector<64xf32> to vector<1x64xf32>
      %cst_13 = arith.constant 2.000000e+00 : f32
      %16 = vector.broadcast %cst_13 : f32 to vector<1x64xf32>
      %17 = arith.divf %15, %16 : vector<1x64xf32>
      %18 = vector.broadcast %17 : vector<1x64xf32> to vector<2x64xf32>
      %19 = arith.subf %13, %18 : vector<2x64xf32>
      %20 = arith.mulf %19, %19 : vector<2x64xf32>
      %cst_14 = arith.constant dense<0.000000e+00> : vector<64xf32>
      %21 = vector.multi_reduction <add>, %20, %cst_14 [0] : vector<2x64xf32> to vector<64xf32>
      %22 = vector.shape_cast %21 : vector<64xf32> to vector<1x64xf32>
      %cst_15 = arith.constant 2.000000e+00 : f32
      %23 = vector.broadcast %cst_15 : f32 to vector<1x64xf32>
      %24 = arith.divf %22, %23 : vector<1x64xf32>
      %25 = vector.broadcast %17 : vector<1x64xf32> to vector<2x64xf32>
      %26 = arith.subf %13, %25 : vector<2x64xf32>
      %cst_16 = arith.constant 9.99999974E-6 : f32
      %27 = vector.broadcast %cst_16 : f32 to vector<1x64xf32>
      %28 = arith.addf %24, %27 : vector<1x64xf32>
      %29 = math.rsqrt %28 : vector<1x64xf32>
      %30 = vector.broadcast %29 : vector<1x64xf32> to vector<2x64xf32>
      %31 = arith.mulf %26, %30 : vector<2x64xf32>
      %c0_17 = arith.constant 0 : index
      %c0_18 = arith.constant 0 : index
      %32 = vector.load %arg5[%c0_17, %c0_18] : memref<1x64xf32, #tpu.memory_space<vmem>>, vector<1x64xf32>
      %33 = vector.broadcast %32 : vector<1x64xf32> to vector<2x64xf32>
      %34 = arith.mulf %31, %33 : vector<2x64xf32>
      %c0_19 = arith.constant 0 : index
      %c0_20 = arith.constant 0 : index
      %35 = vector.load %arg6[%c0_19, %c0_20] : memref<1x64xf32, #tpu.memory_space<vmem>>, vector<1x64xf32>
      %36 = vector.broadcast %35 : vector<1x64xf32> to vector<2x64xf32>
      %37 = arith.addf %34, %36 : vector<2x64xf32>
      %cst_21 = arith.constant 0.000000e+00 : f32
      %38 = vector.broadcast %cst_21 : f32 to vector<2x64xf32>
      %39 = arith.maximumf %37, %38 : vector<2x64xf32>
      %40 = arith.truncf %39 : vector<2x64xf32> to vector<2x64xbf16>
      %c0_22 = arith.constant 0 : index
      %c0_23 = arith.constant 0 : index
      %c0_24 = arith.constant 0 : index
      %41 = vector.load %arg7[%c0_22, %c0_23, %c0_24] : memref<1x2x64xbf16, #tpu.memory_space<vmem>>, vector<1x2x64xbf16>
      %42 = vector.shape_cast %41 : vector<1x2x64xbf16> to vector<2x64xbf16>
      %43 = vector.shape_cast %40 : vector<2x64xbf16> to vector<1x2x64xbf16>
      tpu.vector_store %arg7[%c0_22, %c0_23, %c0_24], %43 {strides = array<i32>} : memref<1x2x64xbf16, #tpu.memory_space<vmem>>, vector<1x2x64xbf16>,
    } else {
    }
    return
  }
  func.func @transform_0(%arg0: i32, %arg1: i32, %arg2: i32) -> (i32, i32, i32) {
    %c0_i32 = arith.constant 0 : i32
    %c0_i32_0 = arith.constant 0 : i32
    return %arg0, %c0_i32, %arg2 : i32, i32, i32
  }
  func.func @transform_1(%arg0: i32, %arg1: i32, %arg2: i32) -> (i32, i32) {
    %c0_i32 = arith.constant 0 : i32
    return %arg2, %arg1 : i32, i32
  }
  func.func @transform_2(%arg0: i32, %arg1: i32, %arg2: i32) -> (i32, i32) {
    %c0_i32 = arith.constant 0 : i32
    %c0_i32_0 = arith.constant 0 : i32
    return %c0_i32, %arg1 : i32, i32
  }
  func.func @transform_3(%arg0: i32, %arg1: i32, %arg2: i32) -> (i32, i32) {
    %c0_i32 = arith.constant 0 : i32
    %c0_i32_0 = arith.constant 0 : i32
    return %c0_i32, %arg1 : i32, i32
  }
  func.func @transform_4(%arg0: i32, %arg1: i32, %arg2: i32) -> (i32, i32, i32) {
    %c0_i32 = arith.constant 0 : i32
    %c0_i32_0 = arith.constant 0 : i32
    return %arg0, %c0_i32, %arg1 : i32, i32, i32
  }
}

module attributes {stable_mosaic.version = 11 : i64} {
  func.func @_ema_kernel(%arg0: i32, %arg1: memref<64x32xf32, #tpu.memory_space<vmem>>, %arg2: memref<64x32xf32, #tpu.memory_space<vmem>>, %arg3: memref<64x32xf32, #tpu.memory_space<vmem>>) attributes {dimension_semantics = [#tpu.dimension_semantics<parallel>], iteration_bounds = array<i64: 1>, scalar_prefetch = 0 : i64, scratch_operands = 0 : i64, tpu.core_type = #tpu.core_type<tc>, window_params = [{transform_indices = @transform_0, window_bounds = array<i64: 64, 32>}, {transform_indices = @transform_1, window_bounds = array<i64: 64, 32>}, {transform_indices = @transform_2, window_bounds = array<i64: 64, 32>}]} {
    %c0 = arith.constant 0 : index
    %c0_0 = arith.constant 0 : index
    %0 = vector.load %arg1[%c0, %c0_0] : memref<64x32xf32, #tpu.memory_space<vmem>>, vector<64x32xf32>
    %cst = arith.constant 9.900000e-01 : f32
    %1 = vector.broadcast %cst : f32 to vector<64x32xf32>
    %2 = arith.mulf %0, %1 : vector<64x32xf32>
    %c0_1 = arith.constant 0 : index
    %c0_2 = arith.constant 0 : index
    %3 = vector.load %arg2[%c0_1, %c0_2] : memref<64x32xf32, #tpu.memory_space<vmem>>, vector<64x32xf32>
    %cst_3 = arith.constant 0.00999999977 : f32
    %4 = vector.broadcast %cst_3 : f32 to vector<64x32xf32>
    %5 = arith.mulf %3, %4 : vector<64x32xf32>
    %6 = arith.addf %2, %5 : vector<64x32xf32>
    %c0_4 = arith.constant 0 : index
    %c0_5 = arith.constant 0 : index
    %7 = vector.load %arg3[%c0_4, %c0_5] : memref<64x32xf32, #tpu.memory_space<vmem>>, vector<64x32xf32>
    tpu.vector_store %arg3[%c0_4, %c0_5], %6 {strides = array<i32>} : memref<64x32xf32, #tpu.memory_space<vmem>>, vector<64x32xf32>,
    return
  }
  func.func @transform_0(%arg0: i32) -> (i32, i32) {
    %c0_i32 = arith.constant 0 : i32
    %c0_i32_0 = arith.constant 0 : i32
    return %arg0, %c0_i32 : i32, i32
  }
  func.func @transform_1(%arg0: i32) -> (i32, i32) {
    %c0_i32 = arith.constant 0 : i32
    %c0_i32_0 = arith.constant 0 : i32
    return %arg0, %c0_i32 : i32, i32
  }
  func.func @transform_2(%arg0: i32) -> (i32, i32) {
    %c0_i32 = arith.constant 0 : i32
    %c0_i32_0 = arith.constant 0 : i32
    return %arg0, %c0_i32 : i32, i32
  }
}

module attributes {stable_mosaic.version = 11 : i64} {
  func.func @_linear_bn_relu_kernel(%arg0: i32, %arg1: i32, %arg2: i32, %arg3: memref<1x2x64xbf16, #tpu.memory_space<vmem>>, %arg4: memref<64x32xbf16, #tpu.memory_space<vmem>>, %arg5: memref<1x2x32xf32, #tpu.memory_space<vmem>>, %arg6: memref<2x32xf32, #tpu.memory_space<vmem>>) attributes {dimension_semantics = [#tpu.dimension_semantics<parallel>, #tpu.dimension_semantics<parallel>, #tpu.dimension_semantics<arbitrary>], iteration_bounds = array<i64: 2, 1, 1>, scalar_prefetch = 0 : i64, scratch_operands = 1 : i64, tpu.core_type = #tpu.core_type<tc>, window_params = [{transform_indices = @transform_0, window_bounds = array<i64: 1, 2, 64>}, {transform_indices = @transform_1, window_bounds = array<i64: 64, 32>}, {transform_indices = @transform_2, window_bounds = array<i64: 1, 2, 32>}]} {
    %c0_i32 = arith.constant 0 : i32
    %0 = arith.cmpi eq, %arg2, %c0_i32 : i32
    %1 = arith.extui %0 : i1 to i32
    %c0_i32_0 = arith.constant 0 : i32
    %2 = arith.cmpi ne, %1, %c0_i32_0 : i32
    scf.if %2 {
      %cst_11 = arith.constant 0.000000e+00 : f32
      %13 = vector.broadcast %cst_11 : f32 to vector<2x32xf32>
      %c0_12 = arith.constant 0 : index
      %c0_13 = arith.constant 0 : index
      %14 = vector.load %arg6[%c0_12, %c0_13] : memref<2x32xf32, #tpu.memory_space<vmem>>, vector<2x32xf32>
      tpu.vector_store %arg6[%c0_12, %c0_13], %13 {strides = array<i32>} : memref<2x32xf32, #tpu.memory_space<vmem>>, vector<2x32xf32>,
    } else {
    }
    %c0 = arith.constant 0 : index
    %c0_1 = arith.constant 0 : index
    %3 = vector.load %arg6[%c0, %c0_1] : memref<2x32xf32, #tpu.memory_space<vmem>>, vector<2x32xf32>
    %c0_2 = arith.constant 0 : index
    %c0_3 = arith.constant 0 : index
    %c0_4 = arith.constant 0 : index
    %4 = vector.load %arg3[%c0_2, %c0_3, %c0_4] : memref<1x2x64xbf16, #tpu.memory_space<vmem>>, vector<1x2x64xbf16>
    %5 = vector.shape_cast %4 : vector<1x2x64xbf16> to vector<2x64xbf16>
    %c0_5 = arith.constant 0 : index
    %c0_6 = arith.constant 0 : index
    %6 = vector.load %arg4[%c0_5, %c0_6] : memref<64x32xbf16, #tpu.memory_space<vmem>>, vector<64x32xbf16>
    %cst = arith.constant dense<0.000000e+00> : vector<2x32xf32>
    %7 = tpu.matmul %5, %6, %cst {dimension_numbers = #tpu.dot_dimension_numbers<[1], [0], [0], [1], [0, 0, 1, 1], [], []>} : vector<2x64xbf16>, vector<64x32xbf16>, vector<2x32xf32> -> vector<2x32xf32>
    %8 = arith.addf %3, %7 : vector<2x32xf32>
    %c0_7 = arith.constant 0 : index
    %c0_8 = arith.constant 0 : index
    %9 = vector.load %arg6[%c0_7, %c0_8] : memref<2x32xf32, #tpu.memory_space<vmem>>, vector<2x32xf32>
    tpu.vector_store %arg6[%c0_7, %c0_8], %8 {strides = array<i32>} : memref<2x32xf32, #tpu.memory_space<vmem>>, vector<2x32xf32>,
    %c0_i32_9 = arith.constant 0 : i32
    %10 = arith.cmpi eq, %arg2, %c0_i32_9 : i32
    %11 = arith.extui %10 : i1 to i32
    %c0_i32_10 = arith.constant 0 : i32
    %12 = arith.cmpi ne, %11, %c0_i32_10 : i32
    scf.if %12 {
      %c0_11 = arith.constant 0 : index
      %c0_12 = arith.constant 0 : index
      %13 = vector.load %arg6[%c0_11, %c0_12] : memref<2x32xf32, #tpu.memory_space<vmem>>, vector<2x32xf32>
      %cst_13 = arith.constant dense<0.000000e+00> : vector<32xf32>
      %14 = vector.multi_reduction <add>, %13, %cst_13 [0] : vector<2x32xf32> to vector<32xf32>
      %15 = vector.shape_cast %14 : vector<32xf32> to vector<1x32xf32>
      %cst_14 = arith.constant 2.000000e+00 : f32
      %16 = vector.broadcast %cst_14 : f32 to vector<1x32xf32>
      %17 = arith.divf %15, %16 : vector<1x32xf32>
      %18 = vector.broadcast %17 : vector<1x32xf32> to vector<2x32xf32>
      %19 = arith.subf %13, %18 : vector<2x32xf32>
      %20 = arith.mulf %19, %19 : vector<2x32xf32>
      %cst_15 = arith.constant dense<0.000000e+00> : vector<32xf32>
      %21 = vector.multi_reduction <add>, %20, %cst_15 [0] : vector<2x32xf32> to vector<32xf32>
      %22 = vector.shape_cast %21 : vector<32xf32> to vector<1x32xf32>
      %cst_16 = arith.constant 2.000000e+00 : f32
      %23 = vector.broadcast %cst_16 : f32 to vector<1x32xf32>
      %24 = arith.divf %22, %23 : vector<1x32xf32>
      %25 = vector.broadcast %17 : vector<1x32xf32> to vector<2x32xf32>
      %26 = arith.subf %13, %25 : vector<2x32xf32>
      %cst_17 = arith.constant 9.99999974E-6 : f32
      %27 = vector.broadcast %cst_17 : f32 to vector<1x32xf32>
      %28 = arith.addf %24, %27 : vector<1x32xf32>
      %29 = math.rsqrt %28 : vector<1x32xf32>
      %30 = vector.broadcast %29 : vector<1x32xf32> to vector<2x32xf32>
      %31 = arith.mulf %26, %30 : vector<2x32xf32>
      %c0_18 = arith.constant 0 : index
      %c0_19 = arith.constant 0 : index
      %c0_20 = arith.constant 0 : index
      %32 = vector.load %arg5[%c0_18, %c0_19, %c0_20] : memref<1x2x32xf32, #tpu.memory_space<vmem>>, vector<1x2x32xf32>
      %33 = vector.shape_cast %32 : vector<1x2x32xf32> to vector<2x32xf32>
      %34 = vector.shape_cast %31 : vector<2x32xf32> to vector<1x2x32xf32>
      tpu.vector_store %arg5[%c0_18, %c0_19, %c0_20], %34 {strides = array<i32>} : memref<1x2x32xf32, #tpu.memory_space<vmem>>, vector<1x2x32xf32>,
    } else {
    }
    return
  }
  func.func @transform_0(%arg0: i32, %arg1: i32, %arg2: i32) -> (i32, i32, i32) {
    %c0_i32 = arith.constant 0 : i32
    %c0_i32_0 = arith.constant 0 : i32
    return %arg0, %c0_i32, %arg2 : i32, i32, i32
  }
  func.func @transform_1(%arg0: i32, %arg1: i32, %arg2: i32) -> (i32, i32) {
    %c0_i32 = arith.constant 0 : i32
    return %arg2, %arg1 : i32, i32
  }
  func.func @transform_2(%arg0: i32, %arg1: i32, %arg2: i32) -> (i32, i32, i32) {
    %c0_i32 = arith.constant 0 : i32
    %c0_i32_0 = arith.constant 0 : i32
    return %arg0, %c0_i32, %arg1 : i32, i32, i32
  }
}

module attributes {stable_mosaic.version = 11 : i64} {
  func.func @_linear_bn_relu_kernel(%arg0: i32, %arg1: i32, %arg2: i32, %arg3: memref<1x2x32xbf16, #tpu.memory_space<vmem>>, %arg4: memref<32x64xbf16, #tpu.memory_space<vmem>>, %arg5: memref<1x64xf32, #tpu.memory_space<vmem>>, %arg6: memref<1x64xf32, #tpu.memory_space<vmem>>, %arg7: memref<1x2x64xbf16, #tpu.memory_space<vmem>>, %arg8: memref<2x64xf32, #tpu.memory_space<vmem>>) attributes {dimension_semantics = [#tpu.dimension_semantics<parallel>, #tpu.dimension_semantics<parallel>, #tpu.dimension_semantics<arbitrary>], iteration_bounds = array<i64: 2, 1, 1>, scalar_prefetch = 0 : i64, scratch_operands = 1 : i64, tpu.core_type = #tpu.core_type<tc>, window_params = [{transform_indices = @transform_0, window_bounds = array<i64: 1, 2, 32>}, {transform_indices = @transform_1, window_bounds = array<i64: 32, 64>}, {transform_indices = @transform_2, window_bounds = array<i64: 1, 64>}, {transform_indices = @transform_3, window_bounds = array<i64: 1, 64>}, {transform_indices = @transform_4, window_bounds = array<i64: 1, 2, 64>}]} {
    %c0_i32 = arith.constant 0 : i32
    %0 = arith.cmpi eq, %arg2, %c0_i32 : i32
    %1 = arith.extui %0 : i1 to i32
    %c0_i32_0 = arith.constant 0 : i32
    %2 = arith.cmpi ne, %1, %c0_i32_0 : i32
    scf.if %2 {
      %cst_11 = arith.constant 0.000000e+00 : f32
      %13 = vector.broadcast %cst_11 : f32 to vector<2x64xf32>
      %c0_12 = arith.constant 0 : index
      %c0_13 = arith.constant 0 : index
      %14 = vector.load %arg8[%c0_12, %c0_13] : memref<2x64xf32, #tpu.memory_space<vmem>>, vector<2x64xf32>
      tpu.vector_store %arg8[%c0_12, %c0_13], %13 {strides = array<i32>} : memref<2x64xf32, #tpu.memory_space<vmem>>, vector<2x64xf32>,
    } else {
    }
    %c0 = arith.constant 0 : index
    %c0_1 = arith.constant 0 : index
    %3 = vector.load %arg8[%c0, %c0_1] : memref<2x64xf32, #tpu.memory_space<vmem>>, vector<2x64xf32>
    %c0_2 = arith.constant 0 : index
    %c0_3 = arith.constant 0 : index
    %c0_4 = arith.constant 0 : index
    %4 = vector.load %arg3[%c0_2, %c0_3, %c0_4] : memref<1x2x32xbf16, #tpu.memory_space<vmem>>, vector<1x2x32xbf16>
    %5 = vector.shape_cast %4 : vector<1x2x32xbf16> to vector<2x32xbf16>
    %c0_5 = arith.constant 0 : index
    %c0_6 = arith.constant 0 : index
    %6 = vector.load %arg4[%c0_5, %c0_6] : memref<32x64xbf16, #tpu.memory_space<vmem>>, vector<32x64xbf16>
    %cst = arith.constant dense<0.000000e+00> : vector<2x64xf32>
    %7 = tpu.matmul %5, %6, %cst {dimension_numbers = #tpu.dot_dimension_numbers<[1], [0], [0], [1], [0, 0, 1, 1], [], []>} : vector<2x32xbf16>, vector<32x64xbf16>, vector<2x64xf32> -> vector<2x64xf32>
    %8 = arith.addf %3, %7 : vector<2x64xf32>
    %c0_7 = arith.constant 0 : index
    %c0_8 = arith.constant 0 : index
    %9 = vector.load %arg8[%c0_7, %c0_8] : memref<2x64xf32, #tpu.memory_space<vmem>>, vector<2x64xf32>
    tpu.vector_store %arg8[%c0_7, %c0_8], %8 {strides = array<i32>} : memref<2x64xf32, #tpu.memory_space<vmem>>, vector<2x64xf32>,
    %c0_i32_9 = arith.constant 0 : i32
    %10 = arith.cmpi eq, %arg2, %c0_i32_9 : i32
    %11 = arith.extui %10 : i1 to i32
    %c0_i32_10 = arith.constant 0 : i32
    %12 = arith.cmpi ne, %11, %c0_i32_10 : i32
    scf.if %12 {
      %c0_11 = arith.constant 0 : index
      %c0_12 = arith.constant 0 : index
      %13 = vector.load %arg8[%c0_11, %c0_12] : memref<2x64xf32, #tpu.memory_space<vmem>>, vector<2x64xf32>
      %cst_13 = arith.constant dense<0.000000e+00> : vector<64xf32>
      %14 = vector.multi_reduction <add>, %13, %cst_13 [0] : vector<2x64xf32> to vector<64xf32>
      %15 = vector.shape_cast %14 : vector<64xf32> to vector<1x64xf32>
      %cst_14 = arith.constant 2.000000e+00 : f32
      %16 = vector.broadcast %cst_14 : f32 to vector<1x64xf32>
      %17 = arith.divf %15, %16 : vector<1x64xf32>
      %18 = vector.broadcast %17 : vector<1x64xf32> to vector<2x64xf32>
      %19 = arith.subf %13, %18 : vector<2x64xf32>
      %20 = arith.mulf %19, %19 : vector<2x64xf32>
      %cst_15 = arith.constant dense<0.000000e+00> : vector<64xf32>
      %21 = vector.multi_reduction <add>, %20, %cst_15 [0] : vector<2x64xf32> to vector<64xf32>
      %22 = vector.shape_cast %21 : vector<64xf32> to vector<1x64xf32>
      %cst_16 = arith.constant 2.000000e+00 : f32
      %23 = vector.broadcast %cst_16 : f32 to vector<1x64xf32>
      %24 = arith.divf %22, %23 : vector<1x64xf32>
      %25 = vector.broadcast %17 : vector<1x64xf32> to vector<2x64xf32>
      %26 = arith.subf %13, %25 : vector<2x64xf32>
      %cst_17 = arith.constant 9.99999974E-6 : f32
      %27 = vector.broadcast %cst_17 : f32 to vector<1x64xf32>
      %28 = arith.addf %24, %27 : vector<1x64xf32>
      %29 = math.rsqrt %28 : vector<1x64xf32>
      %30 = vector.broadcast %29 : vector<1x64xf32> to vector<2x64xf32>
      %31 = arith.mulf %26, %30 : vector<2x64xf32>
      %c0_18 = arith.constant 0 : index
      %c0_19 = arith.constant 0 : index
      %32 = vector.load %arg5[%c0_18, %c0_19] : memref<1x64xf32, #tpu.memory_space<vmem>>, vector<1x64xf32>
      %33 = vector.broadcast %32 : vector<1x64xf32> to vector<2x64xf32>
      %34 = arith.mulf %31, %33 : vector<2x64xf32>
      %c0_20 = arith.constant 0 : index
      %c0_21 = arith.constant 0 : index
      %35 = vector.load %arg6[%c0_20, %c0_21] : memref<1x64xf32, #tpu.memory_space<vmem>>, vector<1x64xf32>
      %36 = vector.broadcast %35 : vector<1x64xf32> to vector<2x64xf32>
      %37 = arith.addf %34, %36 : vector<2x64xf32>
      %cst_22 = arith.constant 0.000000e+00 : f32
      %38 = vector.broadcast %cst_22 : f32 to vector<2x64xf32>
      %39 = arith.maximumf %37, %38 : vector<2x64xf32>
      %40 = arith.truncf %39 : vector<2x64xf32> to vector<2x64xbf16>
      %c0_23 = arith.constant 0 : index
      %c0_24 = arith.constant 0 : index
      %c0_25 = arith.constant 0 : index
      %41 = vector.load %arg7[%c0_23, %c0_24, %c0_25] : memref<1x2x64xbf16, #tpu.memory_space<vmem>>, vector<1x2x64xbf16>
      %42 = vector.shape_cast %41 : vector<1x2x64xbf16> to vector<2x64xbf16>
      %43 = vector.shape_cast %40 : vector<2x64xbf16> to vector<1x2x64xbf16>
      tpu.vector_store %arg7[%c0_23, %c0_24, %c0_25], %43 {strides = array<i32>} : memref<1x2x64xbf16, #tpu.memory_space<vmem>>, vector<1x2x64xbf16>,
    } else {
    }
    return
  }
  func.func @transform_0(%arg0: i32, %arg1: i32, %arg2: i32) -> (i32, i32, i32) {
    %c0_i32 = arith.constant 0 : i32
    %c0_i32_0 = arith.constant 0 : i32
    return %arg0, %c0_i32, %arg2 : i32, i32, i32
  }
  func.func @transform_1(%arg0: i32, %arg1: i32, %arg2: i32) -> (i32, i32) {
    %c0_i32 = arith.constant 0 : i32
    return %arg2, %arg1 : i32, i32
  }
  func.func @transform_2(%arg0: i32, %arg1: i32, %arg2: i32) -> (i32, i32) {
    %c0_i32 = arith.constant 0 : i32
    %c0_i32_0 = arith.constant 0 : i32
    return %c0_i32, %arg1 : i32, i32
  }
  func.func @transform_3(%arg0: i32, %arg1: i32, %arg2: i32) -> (i32, i32) {
    %c0_i32 = arith.constant 0 : i32
    %c0_i32_0 = arith.constant 0 : i32
    return %c0_i32, %arg1 : i32, i32
  }
  func.func @transform_4(%arg0: i32, %arg1: i32, %arg2: i32) -> (i32, i32, i32) {
    %c0_i32 = arith.constant 0 : i32
    %c0_i32_0 = arith.constant 0 : i32
    return %arg0, %c0_i32, %arg1 : i32, i32, i32
  }
}

module attributes {stable_mosaic.version = 11 : i64} {
  func.func @_contrastive_loss_kernel(%arg0: memref<2x2x32xf32, #tpu.memory_space<vmem>>, %arg1: memref<2x2x32xf32, #tpu.memory_space<vmem>>, %arg2: memref<1x1x1xf32, #tpu.memory_space<vmem>>) attributes {dimension_semantics = [], scalar_prefetch = 0 : i64, scratch_operands = 0 : i64, tpu.core_type = #tpu.core_type<tc>} {
    %c0 = arith.constant 0 : index
    %c0_0 = arith.constant 0 : index
    %c0_1 = arith.constant 0 : index
    %0 = vector.load %arg0[%c0, %c0_0, %c0_1] : memref<2x2x32xf32, #tpu.memory_space<vmem>>, vector<2x2x32xf32>
    %c0_2 = arith.constant 0 : index
    %c0_3 = arith.constant 0 : index
    %c0_4 = arith.constant 0 : index
    %1 = vector.load %arg1[%c0_2, %c0_3, %c0_4] : memref<2x2x32xf32, #tpu.memory_space<vmem>>, vector<2x2x32xf32>
    %2 = arith.mulf %0, %0 : vector<2x2x32xf32>
    %cst = arith.constant dense<0.000000e+00> : vector<2x2xf32>
    %3 = vector.multi_reduction <add>, %2, %cst [2] : vector<2x2x32xf32> to vector<2x2xf32>
    %4 = vector.shape_cast %3 : vector<2x2xf32> to vector<2x2x1xf32>
    %cst_5 = arith.constant 1.000000e-24 : f32
    %5 = vector.broadcast %cst_5 : f32 to vector<2x2x1xf32>
    %6 = arith.addf %4, %5 : vector<2x2x1xf32>
    %7 = math.rsqrt %6 : vector<2x2x1xf32>
    %8 = vector.broadcast %7 : vector<2x2x1xf32> to vector<2x2x32xf32>
    %9 = arith.mulf %0, %8 : vector<2x2x32xf32>
    %10 = arith.mulf %1, %1 : vector<2x2x32xf32>
    %cst_6 = arith.constant dense<0.000000e+00> : vector<2x2xf32>
    %11 = vector.multi_reduction <add>, %10, %cst_6 [2] : vector<2x2x32xf32> to vector<2x2xf32>
    %12 = vector.shape_cast %11 : vector<2x2xf32> to vector<2x2x1xf32>
    %cst_7 = arith.constant 1.000000e-24 : f32
    %13 = vector.broadcast %cst_7 : f32 to vector<2x2x1xf32>
    %14 = arith.addf %12, %13 : vector<2x2x1xf32>
    %15 = math.rsqrt %14 : vector<2x2x1xf32>
    %16 = vector.broadcast %15 : vector<2x2x1xf32> to vector<2x2x32xf32>
    %17 = arith.mulf %1, %16 : vector<2x2x32xf32>
    %18 = arith.mulf %9, %17 : vector<2x2x32xf32>
    %cst_8 = arith.constant dense<0.000000e+00> : vector<2x2xf32>
    %19 = vector.multi_reduction <add>, %18, %cst_8 [2] : vector<2x2x32xf32> to vector<2x2xf32>
    %20 = vector.shape_cast %19 : vector<2x2xf32> to vector<2x2x1xf32>
    %cst_9 = arith.constant 1.000000e+00 : f32
    %21 = vector.broadcast %cst_9 : f32 to vector<2x2x1xf32>
    %22 = arith.mulf %20, %21 : vector<2x2x1xf32>
    "tpu.trace_start"() <{level = 10 : i32, message = "vnc,vmc->vnm"}> : () -> ()
    %cst_10 = arith.constant dense<0.000000e+00> : vector<2x2x2xf32>
    %23 = tpu.matmul %9, %17, %cst_10 {dimension_numbers = #tpu.dot_dimension_numbers<[2], [2], [1], [1], [0, 0, 0, 1, 1, 1], [0], [0]>} : vector<2x2x32xf32>, vector<2x2x32xf32>, vector<2x2x2xf32> -> vector<2x2x2xf32>
    "tpu.trace_stop"() : () -> ()
    %cst_11 = arith.constant 1.000000e+00 : f32
    %24 = vector.broadcast %cst_11 : f32 to vector<2x2x2xf32>
    %25 = arith.mulf %23, %24 : vector<2x2x2xf32>
    %cst_12 = arith.constant dense<0xFF800000> : vector<2x2xf32>
    %26 = vector.multi_reduction <maximumf>, %25, %cst_12 [2] : vector<2x2x2xf32> to vector<2x2xf32>
    %27 = vector.shape_cast %26 : vector<2x2xf32> to vector<2x2x1xf32>
    %28 = vector.broadcast %27 : vector<2x2x1xf32> to vector<2x2x2xf32>
    %29 = arith.subf %25, %28 : vector<2x2x2xf32>
    %30 = math.exp %29 : vector<2x2x2xf32>
    %cst_13 = arith.constant dense<0.000000e+00> : vector<2x2xf32>
    %31 = vector.multi_reduction <add>, %30, %cst_13 [2] : vector<2x2x2xf32> to vector<2x2xf32>
    %32 = vector.shape_cast %31 : vector<2x2xf32> to vector<2x2x1xf32>
    %33 = math.log %32 : vector<2x2x1xf32>
    %34 = arith.addf %27, %33 : vector<2x2x1xf32>
    %35 = arith.subf %34, %22 : vector<2x2x1xf32>
    %cst_14 = arith.constant dense<0.000000e+00> : vector<2x1xf32>
    %36 = vector.multi_reduction <add>, %35, %cst_14 [1] : vector<2x2x1xf32> to vector<2x1xf32>
    %37 = vector.shape_cast %36 : vector<2x1xf32> to vector<2x1x1xf32>
    %cst_15 = arith.constant dense<0.000000e+00> : vector<1x1xf32>
    %38 = vector.multi_reduction <add>, %37, %cst_15 [0] : vector<2x1x1xf32> to vector<1x1xf32>
    %39 = vector.shape_cast %38 : vector<1x1xf32> to vector<1x1x1xf32>
    %cst_16 = arith.constant 1.000000e+00 : f32
    %40 = vector.broadcast %cst_16 : f32 to vector<1x1x1xf32>
    %41 = arith.mulf %39, %40 : vector<1x1x1xf32>
    %c0_17 = arith.constant 0 : index
    %c0_18 = arith.constant 0 : index
    %c0_19 = arith.constant 0 : index
    %42 = vector.load %arg2[%c0_17, %c0_18, %c0_19] : memref<1x1x1xf32, #tpu.memory_space<vmem>>, vector<1x1x1xf32>
    tpu.vector_store %arg2[%c0_17, %c0_18, %c0_19], %41 {strides = array<i32>} : memref<1x1x1xf32, #tpu.memory_space<vmem>>, vector<1x1x1xf32>,
    return
  }
}

module attributes {stable_mosaic.version = 11 : i64} {
  func.func @_linear_bn_relu_kernel(%arg0: i32, %arg1: i32, %arg2: i32, %arg3: memref<1x2x64xbf16, #tpu.memory_space<vmem>>, %arg4: memref<64x32xbf16, #tpu.memory_space<vmem>>, %arg5: memref<1x2x32xf32, #tpu.memory_space<vmem>>, %arg6: memref<2x32xf32, #tpu.memory_space<vmem>>) attributes {dimension_semantics = [#tpu.dimension_semantics<parallel>, #tpu.dimension_semantics<parallel>, #tpu.dimension_semantics<arbitrary>], iteration_bounds = array<i64: 2, 1, 1>, scalar_prefetch = 0 : i64, scratch_operands = 1 : i64, tpu.core_type = #tpu.core_type<tc>, window_params = [{transform_indices = @transform_0, window_bounds = array<i64: 1, 2, 64>}, {transform_indices = @transform_1, window_bounds = array<i64: 64, 32>}, {transform_indices = @transform_2, window_bounds = array<i64: 1, 2, 32>}]} {
    %c0_i32 = arith.constant 0 : i32
    %0 = arith.cmpi eq, %arg2, %c0_i32 : i32
    %1 = arith.extui %0 : i1 to i32
    %c0_i32_0 = arith.constant 0 : i32
    %2 = arith.cmpi ne, %1, %c0_i32_0 : i32
    scf.if %2 {
      %cst_11 = arith.constant 0.000000e+00 : f32
      %13 = vector.broadcast %cst_11 : f32 to vector<2x32xf32>
      %c0_12 = arith.constant 0 : index
      %c0_13 = arith.constant 0 : index
      %14 = vector.load %arg6[%c0_12, %c0_13] : memref<2x32xf32, #tpu.memory_space<vmem>>, vector<2x32xf32>
      tpu.vector_store %arg6[%c0_12, %c0_13], %13 {strides = array<i32>} : memref<2x32xf32, #tpu.memory_space<vmem>>, vector<2x32xf32>,
    } else {
    }
    %c0 = arith.constant 0 : index
    %c0_1 = arith.constant 0 : index
    %3 = vector.load %arg6[%c0, %c0_1] : memref<2x32xf32, #tpu.memory_space<vmem>>, vector<2x32xf32>
    %c0_2 = arith.constant 0 : index
    %c0_3 = arith.constant 0 : index
    %c0_4 = arith.constant 0 : index
    %4 = vector.load %arg3[%c0_2, %c0_3, %c0_4] : memref<1x2x64xbf16, #tpu.memory_space<vmem>>, vector<1x2x64xbf16>
    %5 = vector.shape_cast %4 : vector<1x2x64xbf16> to vector<2x64xbf16>
    %c0_5 = arith.constant 0 : index
    %c0_6 = arith.constant 0 : index
    %6 = vector.load %arg4[%c0_5, %c0_6] : memref<64x32xbf16, #tpu.memory_space<vmem>>, vector<64x32xbf16>
    %cst = arith.constant dense<0.000000e+00> : vector<2x32xf32>
    %7 = tpu.matmul %5, %6, %cst {dimension_numbers = #tpu.dot_dimension_numbers<[1], [0], [0], [1], [0, 0, 1, 1], [], []>} : vector<2x64xbf16>, vector<64x32xbf16>, vector<2x32xf32> -> vector<2x32xf32>
    %8 = arith.addf %3, %7 : vector<2x32xf32>
    %c0_7 = arith.constant 0 : index
    %c0_8 = arith.constant 0 : index
    %9 = vector.load %arg6[%c0_7, %c0_8] : memref<2x32xf32, #tpu.memory_space<vmem>>, vector<2x32xf32>
    tpu.vector_store %arg6[%c0_7, %c0_8], %8 {strides = array<i32>} : memref<2x32xf32, #tpu.memory_space<vmem>>, vector<2x32xf32>,
    %c0_i32_9 = arith.constant 0 : i32
    %10 = arith.cmpi eq, %arg2, %c0_i32_9 : i32
    %11 = arith.extui %10 : i1 to i32
    %c0_i32_10 = arith.constant 0 : i32
    %12 = arith.cmpi ne, %11, %c0_i32_10 : i32
    scf.if %12 {
      %c0_11 = arith.constant 0 : index
      %c0_12 = arith.constant 0 : index
      %13 = vector.load %arg6[%c0_11, %c0_12] : memref<2x32xf32, #tpu.memory_space<vmem>>, vector<2x32xf32>
      %c0_13 = arith.constant 0 : index
      %c0_14 = arith.constant 0 : index
      %c0_15 = arith.constant 0 : index
      %14 = vector.load %arg5[%c0_13, %c0_14, %c0_15] : memref<1x2x32xf32, #tpu.memory_space<vmem>>, vector<1x2x32xf32>
      %15 = vector.shape_cast %14 : vector<1x2x32xf32> to vector<2x32xf32>
      %16 = vector.shape_cast %13 : vector<2x32xf32> to vector<1x2x32xf32>
      tpu.vector_store %arg5[%c0_13, %c0_14, %c0_15], %16 {strides = array<i32>} : memref<1x2x32xf32, #tpu.memory_space<vmem>>, vector<1x2x32xf32>,
    } else {
    }
    return
  }
  func.func @transform_0(%arg0: i32, %arg1: i32, %arg2: i32) -> (i32, i32, i32) {
    %c0_i32 = arith.constant 0 : i32
    %c0_i32_0 = arith.constant 0 : i32
    return %arg0, %c0_i32, %arg2 : i32, i32, i32
  }
  func.func @transform_1(%arg0: i32, %arg1: i32, %arg2: i32) -> (i32, i32) {
    %c0_i32 = arith.constant 0 : i32
    return %arg2, %arg1 : i32, i32
  }
  func.func @transform_2(%arg0: i32, %arg1: i32, %arg2: i32) -> (i32, i32, i32) {
    %c0_i32 = arith.constant 0 : i32
    %c0_i32_0 = arith.constant 0 : i32
    return %arg0, %c0_i32, %arg1 : i32, i32, i32
  }
}

</mosaic_0001>

<bundles_post_ra>
// kernel: moco_forward.15
= control target key start
LH: loop header
LB: loop body
LE: loop exit
PB: predicated region body
PF: predicated region fallthrough
CT: control target
= control target key end

     0   :  { %vm16_vm0 = vcmask 516096   ;;  %s46_s0 = inlined_call_operand.vmem [shape: f32[1,64], index: 0, kind: input, shape index: {}, may-alias: {0,2}]   ;;  %s47_s1 = inlined_call_operand.vmem [shape: f32[1,64], index: 1, kind: input, shape index: {}]   ;;  %s48_s2 = inlined_call_operand.vmem [shape: f32[1,64], index: 2, kind: output, shape index: {}, may-alias: {0,2}]  }
   0x1   :  { %v11_v0 = vld [vmem:[%s46_s0] sm:$0x1] }
   0x2   :  { %v13_v1 = vld [vmem:[%s47_s1] sm:$0x1]  ;;  %v12_v2 = vmul.f32 0.99, %v11_v0 }
   0x3   :  { %v14_v3 = vmul.f32 0.01, %v13_v1 }
   0x5   :  { %v15_v4 = vadd.f32 %v14_v3, %v12_v2 }
   0x7   :  { %17 = vst.msk [vmem:[%s48_s2] sm:$0x1] %vm16_vm0, %v15_v4 }

// kernel: moco_forward.17
= control target key start
LH: loop header
LB: loop body
LE: loop exit
PB: predicated region body
PF: predicated region fallthrough
CT: control target
= control target key end

     0   :  { %s666_s9 = smov 0   ;;  %s1145_s0 = inlined_call_operand.vmem [shape: f32[1024,64], index: 0, kind: input, shape index: {}, may-alias: {0,2}]   ;;  %s1146_s1 = inlined_call_operand.vmem [shape: f32[1024,64], index: 1, kind: input, shape index: {}]   ;;  %s1147_s2 = inlined_call_operand.vmem [shape: f32[1024,64], index: 2, kind: output, shape index: {}, may-alias: {0,2}]  }
   0x1 LB: > { %s622_s10 = sadd.s32 4294967295, %s649_s9   ;;  %p626_p0 = scmp.ge.s32.totalorder %s649_s9, 1  ;;  %s649_s9 = sphi %s666_s9, %s12_s9  }
   0x2   : > { %p124_p1 = scmp.lt.s32.totalorder %s649_s9, 3 }
   0x4   : > { %p125_p2 = pnand %p626_p0, %p124_p1 }
   0x6   : > { %128 = sbr.rel (%p125_p2) target bundleno = 110 (0x6e), region = 28 }
   0xb   : > { %s627_s11 = sshll.u32 %s622_s10, 6  ;;  %vm489_vm0 = vcmask 523264  }
   0xc   : > { %p152_p3 = scmp.lt.s32.totalorder %s627_s11, 127 }
   0xe   : > { %s1185_s11 = smov (!%p152_p3, %s627_s11), 127 }
   0xf   : > { %s674_s12 = sshll.u32 %s1185_s11, 3 }
  0x10   : > { %s680_s15 = scalar_lea.vmem %s1145_s0, %s674_s12  ;;  %s727_s18 = scalar_lea.vmem %s1146_s1, %s674_s12 }
  0x11   : > { %v169_v0 = vld [vmem:[%s680_s15] sm:$0xff]  ;;  %v170_v1 = vld [vmem:[%s680_s15 + $0x8] sm:$0xff]  ;;  %v171_v2 = vld [vmem:[%s680_s15 + $0x10] sm:$0xff]  ;;  %s759_s21 = scalar_lea.vmem %s1147_s2, %s674_s12 }
  0x12   : > { %v172_v3 = vld [vmem:[%s680_s15 + $0x18] sm:$0xff]  ;;  %v173_v4 = vld [vmem:[%s680_s15 + $0x20] sm:$0xff]  ;;  %v174_v5 = vld [vmem:[%s680_s15 + $0x28] sm:$0xff]  ;;  %v689_v7 = vmul.f32 0.99, %v169_v0 }
  0x13   : > { %v175_v6 = vld [vmem:[%s680_s15 + $0x30] sm:$0xff]  ;;  %v176_v8 = vld [vmem:[%s680_s15 + $0x38] sm:$0xff]  ;;  %v177_v9 = vld [vmem:[%s680_s15 + $0x40] sm:$0xff]  ;;  %v694_v11 = vmul.f32 0.99, %v170_v1 }
  0x14   : > { %v178_v10 = vld [vmem:[%s680_s15 + $0x48] sm:$0xff]  ;;  %v179_v12 = vld [vmem:[%s680_s15 + $0x50] sm:$0xff]  ;;  %v180_v13 = vld [vmem:[%s680_s15 + $0x58] sm:$0xff]  ;;  %v699_v15 = vmul.f32 0.99, %v171_v2 }
  0x15   : > { %v181_v14 = vld [vmem:[%s680_s15 + $0x60] sm:$0xff]  ;;  %v182_v16 = vld [vmem:[%s680_s15 + $0x68] sm:$0xff]  ;;  %v183_v17 = vld [vmem:[%s680_s15 + $0x70] sm:$0xff]  ;;  %v704_v19 = vmul.f32 0.99, %v172_v3 }
  0x16   : > { %v184_v18 = vld [vmem:[%s680_s15 + $0x78] sm:$0xff]  ;;  %v185_v20 = vld [vmem:[%s680_s15 + $0x80] sm:$0xff]  ;;  %v186_v21 = vld [vmem:[%s680_s15 + $0x88] sm:$0xff]  ;;  %v709_v23 = vmul.f32 0.99, %v173_v4 }
  0x17   : > { %v187_v22 = vld [vmem:[%s680_s15 + $0x90] sm:$0xff]  ;;  %v188_v24 = vld [vmem:[%s680_s15 + $0x98] sm:$0xff]  ;;  %v189_v25 = vld [vmem:[%s680_s15 + $0xa0] sm:$0xff]  ;;  %v713_v26 = vmul.f32 0.99, %v174_v5 }
  0x18   : > { %v715_v27 = vmul.f32 0.99, %v175_v6  ;;  %v717_v28 = vmul.f32 0.99, %v176_v8  ;;  %v719_v29 = vmul.f32 0.99, %v177_v9 }
  0x19   : > { %v721_v30 = vmul.f32 0.99, %v178_v10  ;;  %v729_v31 = vmul.f32 0.99, %v179_v12  ;;  %v731_v32 = vmul.f32 0.99, %v180_v13 }
  0x1a   : > { %v733_v33 = vmul.f32 0.99, %v181_v14  ;;  %v735_v34 = vmul.f32 0.99, %v182_v16  ;;  %v737_v35 = vmul.f32 0.99, %v183_v17 }
  0x1b   : > { %v739_v36 = vmul.f32 0.99, %v184_v18  ;;  %v741_v37 = vmul.f32 0.99, %v185_v20  ;;  %v743_v38 = vmul.f32 0.99, %v186_v21 }
  0x1c   : > { %v745_v39 = vmul.f32 0.99, %v187_v22  ;;  %v297_v40 = vld [vmem:[%s727_s18] sm:$0xff]  ;;  %v298_v41 = vld [vmem:[%s727_s18 + $0x8] sm:$0xff]  ;;  %v749_v42 = vmul.f32 0.99, %v188_v24 }
  0x1d   : > { %v751_v43 = vmul.f32 0.99, %v189_v25  ;;  %v361_v44 = vmul.f32 0.01, %v297_v40  ;;  %v362_v45 = vmul.f32 0.01, %v298_v41 }
  0x1e   : > { %v299_v46 = vld [vmem:[%s727_s18 + $0x10] sm:$0xff]  ;;  %v300_v47 = vld [vmem:[%s727_s18 + $0x18] sm:$0xff]  ;;  %v762_v48 = vld [vmem:[%s680_s15 + $0xa8] sm:$0xff] }
  0x1f   : > { %v765_v49 = vld [vmem:[%s680_s15 + $0xb0] sm:$0xff]  ;;  %v768_v50 = vld [vmem:[%s680_s15 + $0xb8] sm:$0xff]  ;;  %v771_v51 = vld [vmem:[%s680_s15 + $0xc0] sm:$0xff] }
  0x20   : > { %v774_v52 = vld [vmem:[%s680_s15 + $0xc8] sm:$0xff]  ;;  %v777_v53 = vld [vmem:[%s680_s15 + $0xd0] sm:$0xff]  ;;  %v780_v54 = vld [vmem:[%s680_s15 + $0xd8] sm:$0xff] }
  0x21   : > { %v783_v55 = vld [vmem:[%s680_s15 + $0xe0] sm:$0xff]  ;;  %v786_v56 = vld [vmem:[%s680_s15 + $0xe8] sm:$0xff]  ;;  %v789_v57 = vld [vmem:[%s680_s15 + $0xf0] sm:$0xff] }
  0x22   : > { %v792_v58 = vld [vmem:[%s680_s15 + $0xf8] sm:$0xff]  ;;  %v795_v59 = vld [vmem:[%s680_s15 + $0x100] sm:$0xff]  ;;  %v798_v60 = vld [vmem:[%s680_s15 + $0x108] sm:$0xff] }
  0x23   : > { %v801_v61 = vld [vmem:[%s680_s15 + $0x110] sm:$0xff]  ;;  %v804_v62 = vld [vmem:[%s680_s15 + $0x118] sm:$0xff]  ;;  %v807_v63 = vld [vmem:[%s680_s15 + $0x120] sm:$0xff] }
  0x24   : > { %v810_v0 = vld [vmem:[%s680_s15 + $0x128] sm:$0xff]  ;;  %v813_v1 = vld [vmem:[%s680_s15 + $0x130] sm:$0xff]  ;;  %v816_v2 = vld [vmem:[%s680_s15 + $0x138] sm:$0xff] }
  0x25   : > { %v819_v3 = vld [vmem:[%s680_s15 + $0x140] sm:$0xff]  ;;  %v822_v4 = vld [vmem:[%s680_s15 + $0x148] sm:$0xff]  ;;  %v825_v5 = vld [vmem:[%s680_s15 + $0x150] sm:$0xff] }
  0x26   : > { %v828_v6 = vld [vmem:[%s680_s15 + $0x158] sm:$0xff]  ;;  %v831_v8 = vld [vmem:[%s680_s15 + $0x160] sm:$0xff]  ;;  %v834_v9 = vld [vmem:[%s680_s15 + $0x168] sm:$0xff] }
  0x27   : > { %v837_v10 = vld [vmem:[%s680_s15 + $0x170] sm:$0xff]  ;;  %v840_v12 = vld [vmem:[%s680_s15 + $0x178] sm:$0xff]  ;;  %v843_v13 = vld [vmem:[%s680_s15 + $0x180] sm:$0xff] }
  0x28   : > { %1148 = vst [vmem:[#allocation2_spill] sm:$0xff] %v837_v10  ;;  %1149 = vst [vmem:[#allocation3_spill] sm:$0xff] %v840_v12  ;;  %v846_v14 = vld [vmem:[%s680_s15 + $0x188] sm:$0xff]  ;;  %v849_v16 = vld [vmem:[%s680_s15 + $0x190] sm:$0xff] }
  0x29   : > { %1150 = vst [vmem:[#allocation4_spill] sm:$0xff] %v843_v13  ;;  %1151 = vst [vmem:[#allocation5_spill] sm:$0xff] %v846_v14  ;;  %v852_v17 = vld [vmem:[%s680_s15 + $0x198] sm:$0xff]  ;;  %v855_v18 = vld [vmem:[%s680_s15 + $0x1a0] sm:$0xff] }
  0x2a   : > { %1152 = vst [vmem:[#allocation6_spill] sm:$0xff] %v849_v16  ;;  %1153 = vst [vmem:[#allocation7_spill] sm:$0xff] %v852_v17  ;;  %v858_v20 = vld [vmem:[%s680_s15 + $0x1a8] sm:$0xff]  ;;  %v861_v21 = vld [vmem:[%s680_s15 + $0x1b0] sm:$0xff] }
  0x2b   : > { %1154 = vst [vmem:[#allocation8_spill] sm:$0xff] %v855_v18  ;;  %1155 = vst [vmem:[#allocation9_spill] sm:$0xff] %v858_v20  ;;  %v864_v22 = vld [vmem:[%s680_s15 + $0x1b8] sm:$0xff]  ;;  %v867_v24 = vld [vmem:[%s680_s15 + $0x1c0] sm:$0xff] }
  0x2c   : > { %1156 = vst [vmem:[#allocation10_spill] sm:$0xff] %v861_v21  ;;  %1157 = vst [vmem:[#allocation11_spill] sm:$0xff] %v864_v22  ;;  %v870_v25 = vld [vmem:[%s680_s15 + $0x1c8] sm:$0xff]  ;;  %v873_v40 = vld [vmem:[%s680_s15 + $0x1d0] sm:$0xff]  ;;  %v363_v22 = vmul.f32 0.01, %v299_v46 }
  0x2d   : > { %1158 = vst [vmem:[#allocation12_spill] sm:$0xff] %v867_v24  ;;  %1159 = vst [vmem:[#allocation13_spill] sm:$0xff] %v870_v25  ;;  %v876_v41 = vld [vmem:[%s680_s15 + $0x1d8] sm:$0xff]  ;;  %v879_v17 = vld [vmem:[%s680_s15 + $0x1e0] sm:$0xff]  ;;  %v364_v24 = vmul.f32 0.01, %v300_v47 }
  0x2e   : > { %1160 = vst [vmem:[#allocation14_spill] sm:$0xff] %v873_v40  ;;  %1161 = vst [vmem:[#allocation15_spill] sm:$0xff] %v876_v41  ;;  %v882_v16 = vld [vmem:[%s680_s15 + $0x1e8] sm:$0xff]  ;;  %v885_v18 = vld [vmem:[%s680_s15 + $0x1f0] sm:$0xff]  ;;  %v425_v40 = vadd.f32 %v361_v44, %v689_v7  ;;  %v426_v41 = vadd.f32 %v362_v45, %v694_v11 }
  0x2f   : > { %1162 = vst [vmem:[#allocation16_spill] sm:$0xff] %v879_v17  ;;  %1163 = vst [vmem:[#allocation17_spill] sm:$0xff] %v882_v16  ;;  %v888_v21 = vld [vmem:[%s680_s15 + $0x1f8] sm:$0xff]  ;;  %v301_v25 = vld [vmem:[%s727_s18 + $0x20] sm:$0xff]  ;;  %v428_v46 = vadd.f32 %v364_v24, %v704_v19 }
  0x30   : > { %1164 = vst [vmem:[#allocation18_spill] sm:$0xff] %v885_v18  ;;  %1165 = vst [vmem:[#allocation19_spill] sm:$0xff] %v888_v21  ;;  %v302_v20 = vld [vmem:[%s727_s18 + $0x28] sm:$0xff]  ;;  %v365_v14 = vmul.f32 0.01, %v301_v25  ;;  %v303_v16 = vld [vmem:[%s727_s18 + $0x30] sm:$0xff]  ;;  %v427_v21 = vadd.f32 %v363_v22, %v699_v15 }
  0x31   : > { %v366_v17 = vmul.f32 0.01, %v302_v20  ;;  %v304_v18 = vld [vmem:[%s727_s18 + $0x38] sm:$0xff]  ;;  %v367_v47 = vmul.f32 0.01, %v303_v16  ;;  %v305_v12 = vld [vmem:[%s727_s18 + $0x40] sm:$0xff] }
  0x32   : > { %v368_v13 = vmul.f32 0.01, %v304_v18  ;;  %v306_v10 = vld [vmem:[%s727_s18 + $0x48] sm:$0xff]  ;;  %490 = vst.msk [vmem:[%s759_s21] sm:$0xff] %vm489_vm0, %v425_v40  ;;  %491 = vst.msk [vmem:[%s759_s21 + $0x8] sm:$0xff] %vm489_vm0, %v426_v41  ;;  %v429_v7 = vadd.f32 %v365_v14, %v709_v23  ;;  %v307_v45 = vld [vmem:[%s727_s18 + $0x50] sm:$0xff] }
  0x33   : > { %v430_v11 = vadd.f32 %v366_v17, %v713_v26  ;;  %v369_v44 = vmul.f32 0.01, %v305_v12  ;;  %v370_v15 = vmul.f32 0.01, %v306_v10  ;;  %v308_v19 = vld [vmem:[%s727_s18 + $0x58] sm:$0xff]  ;;  %492 = vst.msk [vmem:[%s759_s21 + $0x10] sm:$0xff] %vm489_vm0, %v427_v21  ;;  %v431_v16 = vadd.f32 %v367_v47, %v715_v27 }
  0x34   : > { %493 = vst.msk [vmem:[%s759_s21 + $0x18] sm:$0xff] %vm489_vm0, %v428_v46  ;;  %v432_v18 = vadd.f32 %v368_v13, %v717_v28  ;;  %v371_v20 = vmul.f32 0.01, %v307_v45  ;;  %v372_v23 = vmul.f32 0.01, %v308_v19  ;;  %v309_v14 = vld [vmem:[%s727_s18 + $0x60] sm:$0xff] }
  0x35   : > { %v310_v26 = vld [vmem:[%s727_s18 + $0x68] sm:$0xff]  ;;  %494 = vst.msk [vmem:[%s759_s21 + $0x20] sm:$0xff] %vm489_vm0, %v429_v7  ;;  %495 = vst.msk [vmem:[%s759_s21 + $0x28] sm:$0xff] %vm489_vm0, %v430_v11  ;;  %v433_v10 = vadd.f32 %v369_v44, %v719_v29  ;;  %v434_v12 = vadd.f32 %v370_v15, %v721_v30  ;;  %v373_v17 = vmul.f32 0.01, %v309_v14  ;;  %v311_v21 = vld [vmem:[%s727_s18 + $0x70] sm:$0xff] }
  0x36   : > { %v374_v27 = vmul.f32 0.01, %v310_v26  ;;  %v312_v28 = vld [vmem:[%s727_s18 + $0x78] sm:$0xff]  ;;  %496 = vst.msk [vmem:[%s759_s21 + $0x30] sm:$0xff] %vm489_vm0, %v431_v16  ;;  %497 = vst.msk [vmem:[%s759_s21 + $0x38] sm:$0xff] %vm489_vm0, %v432_v18  ;;  %v435_v13 = vadd.f32 %v371_v20, %v729_v31  ;;  %v436_v22 = vadd.f32 %v372_v23, %v731_v32  ;;  %v313_v25 = vld [vmem:[%s727_s18 + $0x80] sm:$0xff] }
  0x37   : > { %v375_v24 = vmul.f32 0.01, %v311_v21  ;;  %v376_v29 = vmul.f32 0.01, %v312_v28  ;;  %v314_v30 = vld [vmem:[%s727_s18 + $0x88] sm:$0xff]  ;;  %498 = vst.msk [vmem:[%s759_s21 + $0x40] sm:$0xff] %vm489_vm0, %v433_v10  ;;  %v437_v40 = vadd.f32 %v373_v17, %v733_v33 }
  0x38   : > { %499 = vst.msk [vmem:[%s759_s21 + $0x48] sm:$0xff] %vm489_vm0, %v434_v12  ;;  %v438_v41 = vadd.f32 %v374_v27, %v735_v34  ;;  %v377_v46 = vmul.f32 0.01, %v313_v25  ;;  %v378_v31 = vmul.f32 0.01, %v314_v30  ;;  %v315_v47 = vld [vmem:[%s727_s18 + $0x90] sm:$0xff] }
  0x39   : > { %v316_v32 = vld [vmem:[%s727_s18 + $0x98] sm:$0xff]  ;;  %500 = vst.msk [vmem:[%s759_s21 + $0x50] sm:$0xff] %vm489_vm0, %v435_v13  ;;  %501 = vst.msk [vmem:[%s759_s21 + $0x58] sm:$0xff] %vm489_vm0, %v436_v22  ;;  %v439_v7 = vadd.f32 %v375_v24, %v737_v35  ;;  %v440_v11 = vadd.f32 %v376_v29, %v739_v36  ;;  %v379_v44 = vmul.f32 0.01, %v315_v47  ;;  %v317_v15 = vld [vmem:[%s727_s18 + $0xa0] sm:$0xff] }
  0x3a   : > { %v380_v33 = vmul.f32 0.01, %v316_v32  ;;  %v318_v34 = vld [vmem:[%s727_s18 + $0xa8] sm:$0xff]  ;;  %502 = vst.msk [vmem:[%s759_s21 + $0x60] sm:$0xff] %vm489_vm0, %v437_v40  ;;  %503 = vst.msk [vmem:[%s759_s21 + $0x68] sm:$0xff] %vm489_vm0, %v438_v41  ;;  %v441_v45 = vadd.f32 %v377_v46, %v741_v37  ;;  %v442_v19 = vadd.f32 %v378_v31, %v743_v38  ;;  %v319_v36 = vld [vmem:[%s727_s18 + $0xb0] sm:$0xff] }
  0x3b   : > { %v381_v16 = vmul.f32 0.01, %v317_v15  ;;  %v254_v35 = vmul.f32 0.99, %v762_v48  ;;  %v320_v18 = vld [vmem:[%s727_s18 + $0xb8] sm:$0xff]  ;;  %504 = vst.msk [vmem:[%s759_s21 + $0x70] sm:$0xff] %vm489_vm0, %v439_v7  ;;  %v443_v20 = vadd.f32 %v379_v44, %v745_v39 }
  0x3c   : > { %505 = vst.msk [vmem:[%s759_s21 + $0x78] sm:$0xff] %vm489_vm0, %v440_v11  ;;  %v444_v23 = vadd.f32 %v380_v33, %v749_v42  ;;  %v382_v14 = vmul.f32 0.01, %v318_v34  ;;  %v255_v37 = vmul.f32 0.99, %v765_v49  ;;  %v321_v38 = vld [vmem:[%s727_s18 + $0xc0] sm:$0xff] }
  0x3d   : > { %v322_v26 = vld [vmem:[%s727_s18 + $0xc8] sm:$0xff]  ;;  %506 = vst.msk [vmem:[%s759_s21 + $0x80] sm:$0xff] %vm489_vm0, %v441_v45  ;;  %507 = vst.msk [vmem:[%s759_s21 + $0x88] sm:$0xff] %vm489_vm0, %v442_v19  ;;  %v445_v48 = vadd.f32 %v381_v16, %v751_v43  ;;  %v383_v10 = vmul.f32 0.01, %v319_v36  ;;  %v323_v13 = vld [vmem:[%s727_s18 + $0xd0] sm:$0xff] }
  0x3e   : > { %v256_v39 = vmul.f32 0.99, %v768_v50  ;;  %v384_v12 = vmul.f32 0.01, %v320_v18  ;;  %508 = vst.msk [vmem:[%s759_s21 + $0x90] sm:$0xff] %vm489_vm0, %v443_v20  ;;  %509 = vst.msk [vmem:[%s759_s21 + $0x98] sm:$0xff] %vm489_vm0, %v444_v23  ;;  %v446_v42 = vadd.f32 %v382_v14, %v254_v35 }
  0x3f   : > { %v257_v49 = vmul.f32 0.99, %v771_v51  ;;  %v385_v17 = vmul.f32 0.01, %v321_v38  ;;  %v258_v27 = vmul.f32 0.99, %v774_v52  ;;  %v447_v43 = vadd.f32 %v383_v10, %v255_v37 }
  0x40   : > { %510 = vst.msk [vmem:[%s759_s21 + $0xa0] sm:$0xff] %vm489_vm0, %v445_v48  ;;  %v448_v21 = vadd.f32 %v384_v12, %v256_v39  ;;  %v386_v50 = vmul.f32 0.01, %v322_v26  ;;  %v259_v28 = vmul.f32 0.99, %v777_v53  ;;  %v324_v22 = vld [vmem:[%s727_s18 + $0xd8] sm:$0xff] }
  0x41   : > { %511 = vst.msk [vmem:[%s759_s21 + $0xa8] sm:$0xff] %vm489_vm0, %v446_v42  ;;  %v449_v24 = vadd.f32 %v385_v17, %v257_v49  ;;  %v387_v51 = vmul.f32 0.01, %v323_v13  ;;  %v260_v52 = vmul.f32 0.99, %v780_v54  ;;  %512 = vst.msk [vmem:[%s759_s21 + $0xb0] sm:$0xff] %vm489_vm0, %v447_v43 }
  0x42   : > { %v388_v29 = vmul.f32 0.01, %v324_v22  ;;  %513 = vst.msk [vmem:[%s759_s21 + $0xb8] sm:$0xff] %vm489_vm0, %v448_v21  ;;  %v450_v25 = vadd.f32 %v386_v50, %v258_v27  ;;  %v261_v53 = vmul.f32 0.99, %v783_v55  ;;  %v325_v30 = vld [vmem:[%s727_s18 + $0xe0] sm:$0xff] }
  0x43   : > { %v262_v40 = vmul.f32 0.99, %v786_v56  ;;  %v326_v41 = vld [vmem:[%s727_s18 + $0xe8] sm:$0xff]  ;;  %514 = vst.msk [vmem:[%s759_s21 + $0xc0] sm:$0xff] %vm489_vm0, %v449_v24  ;;  %v451_v46 = vadd.f32 %v387_v51, %v259_v28  ;;  %v389_v31 = vmul.f32 0.01, %v325_v30 }
  0x44   : > { %v452_v54 = vadd.f32 %v388_v29, %v260_v52  ;;  %v390_v47 = vmul.f32 0.01, %v326_v41  ;;  %v327_v32 = vld [vmem:[%s727_s18 + $0xf0] sm:$0xff]  ;;  %v328_v7 = vld [vmem:[%s727_s18 + $0xf8] sm:$0xff]  ;;  %515 = vst.msk [vmem:[%s759_s21 + $0xc8] sm:$0xff] %vm489_vm0, %v450_v25  ;;  %v329_v45 = vld [vmem:[%s727_s18 + $0x100] sm:$0xff] }
  0x45   : > { %v263_v55 = vmul.f32 0.99, %v789_v57  ;;  %v391_v11 = vmul.f32 0.01, %v327_v32  ;;  %v264_v56 = vmul.f32 0.99, %v792_v58  ;;  %v453_v44 = vadd.f32 %v389_v31, %v261_v53 }
  0x46   : > { %516 = vst.msk [vmem:[%s759_s21 + $0xd0] sm:$0xff] %vm489_vm0, %v451_v46  ;;  %517 = vst.msk [vmem:[%s759_s21 + $0xd8] sm:$0xff] %vm489_vm0, %v452_v54  ;;  %v454_v33 = vadd.f32 %v390_v47, %v262_v40  ;;  %v392_v15 = vmul.f32 0.01, %v328_v7  ;;  %v265_v34 = vmul.f32 0.99, %v795_v59 }
  0x47   : > { %v330_v19 = vld [vmem:[%s727_s18 + $0x108] sm:$0xff]  ;;  %v455_v16 = vadd.f32 %v391_v11, %v263_v55  ;;  %v393_v57 = vmul.f32 0.01, %v329_v45  ;;  %v266_v58 = vmul.f32 0.99, %v798_v60  ;;  %518 = vst.msk [vmem:[%s759_s21 + $0xe0] sm:$0xff] %vm489_vm0, %v453_v44 }
  0x48   : > { %v394_v35 = vmul.f32 0.01, %v330_v19  ;;  %519 = vst.msk [vmem:[%s759_s21 + $0xe8] sm:$0xff] %vm489_vm0, %v454_v33  ;;  %v456_v36 = vadd.f32 %v392_v15, %v264_v56  ;;  %v267_v18 = vmul.f32 0.99, %v801_v61  ;;  %v331_v59 = vld [vmem:[%s727_s18 + $0x110] sm:$0xff] }
  0x49   : > { %v268_v20 = vmul.f32 0.99, %v804_v62  ;;  %v332_v23 = vld [vmem:[%s727_s18 + $0x118] sm:$0xff]  ;;  %520 = vst.msk [vmem:[%s759_s21 + $0xf0] sm:$0xff] %vm489_vm0, %v455_v16  ;;  %v457_v14 = vadd.f32 %v393_v57, %v265_v34  ;;  %v395_v37 = vmul.f32 0.01, %v331_v59 }
  0x4a   : > { %v458_v60 = vadd.f32 %v394_v35, %v266_v58  ;;  %v396_v38 = vmul.f32 0.01, %v332_v23  ;;  %v333_v26 = vld [vmem:[%s727_s18 + $0x120] sm:$0xff]  ;;  %v334_v48 = vld [vmem:[%s727_s18 + $0x128] sm:$0xff]  ;;  %521 = vst.msk [vmem:[%s759_s21 + $0xf8] sm:$0xff] %vm489_vm0, %v456_v36  ;;  %v335_v17 = vld [vmem:[%s727_s18 + $0x130] sm:$0xff] }
  0x4b   : > { %v269_v61 = vmul.f32 0.99, %v807_v63  ;;  %v397_v10 = vmul.f32 0.01, %v333_v26  ;;  %v270_v62 = vmul.f32 0.99, %v810_v0  ;;  %v459_v39 = vadd.f32 %v395_v37, %v267_v18 }
  0x4c   : > { %522 = vst.msk [vmem:[%s759_s21 + $0x100] sm:$0xff] %vm489_vm0, %v457_v14  ;;  %523 = vst.msk [vmem:[%s759_s21 + $0x108] sm:$0xff] %vm489_vm0, %v458_v60  ;;  %v460_v12 = vadd.f32 %v396_v38, %v268_v20  ;;  %v398_v42 = vmul.f32 0.01, %v334_v48  ;;  %v271_v49 = vmul.f32 0.99, %v813_v1 }
  0x4d   : > { %v336_v27 = vld [vmem:[%s727_s18 + $0x138] sm:$0xff]  ;;  %v461_v43 = vadd.f32 %v397_v10, %v269_v61  ;;  %v399_v63 = vmul.f32 0.01, %v335_v17  ;;  %v272_v0 = vmul.f32 0.99, %v816_v2  ;;  %524 = vst.msk [vmem:[%s759_s21 + $0x110] sm:$0xff] %vm489_vm0, %v459_v39 }
  0x4e   : > { %v400_v21 = vmul.f32 0.01, %v336_v27  ;;  %525 = vst.msk [vmem:[%s759_s21 + $0x118] sm:$0xff] %vm489_vm0, %v460_v12  ;;  %v462_v50 = vadd.f32 %v398_v42, %v270_v62  ;;  %v273_v28 = vmul.f32 0.99, %v819_v3  ;;  %v337_v1 = vld [vmem:[%s727_s18 + $0x140] sm:$0xff] }
  0x4f   : > { %v274_v13 = vmul.f32 0.99, %v822_v4  ;;  %v338_v22 = vld [vmem:[%s727_s18 + $0x148] sm:$0xff]  ;;  %526 = vst.msk [vmem:[%s759_s21 + $0x120] sm:$0xff] %vm489_vm0, %v461_v43  ;;  %v463_v24 = vadd.f32 %v399_v63, %v271_v49  ;;  %v401_v51 = vmul.f32 0.01, %v337_v1 }
  0x50   : > { %v464_v2 = vadd.f32 %v400_v21, %v272_v0  ;;  %v402_v52 = vmul.f32 0.01, %v338_v22  ;;  %v339_v29 = vld [vmem:[%s727_s18 + $0x150] sm:$0xff]  ;;  %v340_v25 = vld [vmem:[%s727_s18 + $0x158] sm:$0xff]  ;;  %527 = vst.msk [vmem:[%s759_s21 + $0x128] sm:$0xff] %vm489_vm0, %v462_v50  ;;  %v341_v54 = vld [vmem:[%s727_s18 + $0x160] sm:$0xff] }
  0x51   : > { %v275_v3 = vmul.f32 0.99, %v825_v5  ;;  %v403_v53 = vmul.f32 0.01, %v339_v29  ;;  %v276_v4 = vmul.f32 0.99, %v828_v6  ;;  %v465_v30 = vadd.f32 %v401_v51, %v273_v28 }
  0x52   : > { %528 = vst.msk [vmem:[%s759_s21 + $0x130] sm:$0xff] %vm489_vm0, %v463_v24  ;;  %529 = vst.msk [vmem:[%s759_s21 + $0x138] sm:$0xff] %vm489_vm0, %v464_v2  ;;  %v466_v40 = vadd.f32 %v402_v52, %v274_v13  ;;  %v404_v41 = vmul.f32 0.01, %v340_v25  ;;  %v277_v46 = vmul.f32 0.99, %v831_v8 }
  0x53   : > { %v342_v31 = vld [vmem:[%s727_s18 + $0x168] sm:$0xff]  ;;  %v467_v47 = vadd.f32 %v403_v53, %v275_v3  ;;  %v405_v5 = vmul.f32 0.01, %v341_v54  ;;  %v278_v6 = vmul.f32 0.99, %v834_v9  ;;  %530 = vst.msk [vmem:[%s759_s21 + $0x140] sm:$0xff] %vm489_vm0, %v465_v30 }
  0x54   : > { %v406_v32 = vmul.f32 0.01, %v342_v31  ;;  %531 = vst.msk [vmem:[%s759_s21 + $0x148] sm:$0xff] %vm489_vm0, %v466_v40  ;;  %v468_v7 = vadd.f32 %v404_v41, %v276_v4  ;;  %v1166_v55 = vld [vmem:[#allocation2_spill] sm:$0xff]  ;;  %v343_v8 = vld [vmem:[%s727_s18 + $0x170] sm:$0xff]  ;;  %v1167_v56 = vld [vmem:[#allocation3_spill] sm:$0xff] }
  0x55   : > { %v279_v11 = vmul.f32 0.99, %v1166_v55  ;;  %v280_v44 = vmul.f32 0.99, %v1167_v56  ;;  %v344_v33 = vld [vmem:[%s727_s18 + $0x178] sm:$0xff]  ;;  %532 = vst.msk [vmem:[%s759_s21 + $0x150] sm:$0xff] %vm489_vm0, %v467_v47  ;;  %v469_v15 = vadd.f32 %v405_v5, %v277_v46 }
  0x56   : > { %v470_v9 = vadd.f32 %v406_v32, %v278_v6  ;;  %v407_v34 = vmul.f32 0.01, %v343_v8  ;;  %v408_v45 = vmul.f32 0.01, %v344_v33  ;;  %v345_v19 = vld [vmem:[%s727_s18 + $0x180] sm:$0xff]  ;;  %v346_v16 = vld [vmem:[%s727_s18 + $0x188] sm:$0xff] }
  0x57   : > { %533 = vst.msk [vmem:[%s759_s21 + $0x158] sm:$0xff] %vm489_vm0, %v468_v7  ;;  %v1168_v57 = vld [vmem:[#allocation4_spill] sm:$0xff]  ;;  %v409_v35 = vmul.f32 0.01, %v345_v19  ;;  %v1169_v36 = vld [vmem:[#allocation5_spill] sm:$0xff]  ;;  %534 = vst.msk [vmem:[%s759_s21 + $0x160] sm:$0xff] %vm489_vm0, %v469_v15 }
  0x58   : > { %v281_v58 = vmul.f32 0.99, %v1168_v57  ;;  %v282_v18 = vmul.f32 0.99, %v1169_v36  ;;  %535 = vst.msk [vmem:[%s759_s21 + $0x168] sm:$0xff] %vm489_vm0, %v470_v9  ;;  %v471_v59 = vadd.f32 %v407_v34, %v279_v11  ;;  %v472_v20 = vadd.f32 %v408_v45, %v280_v44  ;;  %v1170_v14 = vld [vmem:[#allocation6_spill] sm:$0xff] }
  0x59   : > { %v410_v23 = vmul.f32 0.01, %v346_v16  ;;  %v283_v60 = vmul.f32 0.99, %v1170_v14  ;;  %v347_v37 = vld [vmem:[%s727_s18 + $0x190] sm:$0xff]  ;;  %v348_v38 = vld [vmem:[%s727_s18 + $0x198] sm:$0xff] }
  0x5a   : > { %v473_v26 = vadd.f32 %v409_v35, %v281_v58  ;;  %v411_v48 = vmul.f32 0.01, %v347_v37  ;;  %v1171_v61 = vld [vmem:[#allocation7_spill] sm:$0xff]  ;;  %v412_v62 = vmul.f32 0.01, %v348_v38  ;;  %536 = vst.msk [vmem:[%s759_s21 + $0x170] sm:$0xff] %vm489_vm0, %v471_v59 }
  0x5b   : > { %v284_v10 = vmul.f32 0.99, %v1171_v61  ;;  %537 = vst.msk [vmem:[%s759_s21 + $0x178] sm:$0xff] %vm489_vm0, %v472_v20  ;;  %v474_v39 = vadd.f32 %v410_v23, %v282_v18  ;;  %v1172_v12 = vld [vmem:[#allocation8_spill] sm:$0xff]  ;;  %v349_v49 = vld [vmem:[%s727_s18 + $0x1a0] sm:$0xff]  ;;  %v1173_v17 = vld [vmem:[#allocation9_spill] sm:$0xff] }
  0x5c   : > { %v285_v42 = vmul.f32 0.99, %v1172_v12  ;;  %v286_v27 = vmul.f32 0.99, %v1173_v17  ;;  %v350_v43 = vld [vmem:[%s727_s18 + $0x1a8] sm:$0xff]  ;;  %538 = vst.msk [vmem:[%s759_s21 + $0x180] sm:$0xff] %vm489_vm0, %v473_v26  ;;  %v475_v63 = vadd.f32 %v411_v48, %v283_v60 }
  0x5d   : > { %v476_v0 = vadd.f32 %v412_v62, %v284_v10  ;;  %v413_v21 = vmul.f32 0.01, %v349_v49  ;;  %v414_v50 = vmul.f32 0.01, %v350_v43  ;;  %v351_v28 = vld [vmem:[%s727_s18 + $0x1b0] sm:$0xff]  ;;  %v352_v1 = vld [vmem:[%s727_s18 + $0x1b8] sm:$0xff] }
  0x5e   : > { %539 = vst.msk [vmem:[%s759_s21 + $0x188] sm:$0xff] %vm489_vm0, %v474_v39  ;;  %v1174_v13 = vld [vmem:[#allocation10_spill] sm:$0xff]  ;;  %v415_v24 = vmul.f32 0.01, %v351_v28  ;;  %v1175_v2 = vld [vmem:[#allocation11_spill] sm:$0xff]  ;;  %540 = vst.msk [vmem:[%s759_s21 + $0x190] sm:$0xff] %vm489_vm0, %v475_v63 }
  0x5f   : > { %v287_v22 = vmul.f32 0.99, %v1174_v13  ;;  %v288_v51 = vmul.f32 0.99, %v1175_v2  ;;  %541 = vst.msk [vmem:[%s759_s21 + $0x198] sm:$0xff] %vm489_vm0, %v476_v0  ;;  %v477_v52 = vadd.f32 %v413_v21, %v285_v42  ;;  %v478_v29 = vadd.f32 %v414_v50, %v286_v27  ;;  %v1176_v3 = vld [vmem:[#allocation12_spill] sm:$0xff] }
  0x60   : > { %v416_v25 = vmul.f32 0.01, %v352_v1  ;;  %v289_v53 = vmul.f32 0.99, %v1176_v3  ;;  %v353_v4 = vld [vmem:[%s727_s18 + $0x1c0] sm:$0xff]  ;;  %v354_v30 = vld [vmem:[%s727_s18 + $0x1c8] sm:$0xff] }
  0x61   : > { %v479_v40 = vadd.f32 %v415_v24, %v287_v22  ;;  %v417_v41 = vmul.f32 0.01, %v353_v4  ;;  %v1177_v46 = vld [vmem:[#allocation13_spill] sm:$0xff]  ;;  %v418_v31 = vmul.f32 0.01, %v354_v30  ;;  %542 = vst.msk [vmem:[%s759_s21 + $0x1a0] sm:$0xff] %vm489_vm0, %v477_v52 }
  0x62   : > { %v290_v54 = vmul.f32 0.99, %v1177_v46  ;;  %543 = vst.msk [vmem:[%s759_s21 + $0x1a8] sm:$0xff] %vm489_vm0, %v478_v29  ;;  %v480_v47 = vadd.f32 %v416_v25, %v288_v51  ;;  %v1178_v5 = vld [vmem:[#allocation14_spill] sm:$0xff]  ;;  %v355_v32 = vld [vmem:[%s727_s18 + $0x1d0] sm:$0xff]  ;;  %v1179_v7 = vld [vmem:[#allocation15_spill] sm:$0xff] }
  0x63   : > { %v291_v6 = vmul.f32 0.99, %v1178_v5  ;;  %v292_v55 = vmul.f32 0.99, %v1179_v7  ;;  %v356_v11 = vld [vmem:[%s727_s18 + $0x1d8] sm:$0xff]  ;;  %544 = vst.msk [vmem:[%s759_s21 + $0x1b0] sm:$0xff] %vm489_vm0, %v479_v40  ;;  %v481_v8 = vadd.f32 %v417_v41, %v289_v53 }
  0x64   : > { %v482_v56 = vadd.f32 %v418_v31, %v290_v54  ;;  %v419_v44 = vmul.f32 0.01, %v355_v32  ;;  %v420_v33 = vmul.f32 0.01, %v356_v11  ;;  %v357_v15 = vld [vmem:[%s727_s18 + $0x1e0] sm:$0xff]  ;;  %v358_v9 = vld [vmem:[%s727_s18 + $0x1e8] sm:$0xff] }
  0x65   : > { %545 = vst.msk [vmem:[%s759_s21 + $0x1b8] sm:$0xff] %vm489_vm0, %v480_v47  ;;  %v1180_v34 = vld [vmem:[#allocation16_spill] sm:$0xff]  ;;  %v421_v19 = vmul.f32 0.01, %v357_v15  ;;  %v1181_v16 = vld [vmem:[#allocation17_spill] sm:$0xff]  ;;  %546 = vst.msk [vmem:[%s759_s21 + $0x1c0] sm:$0xff] %vm489_vm0, %v481_v8 }
  0x66   : > { %v293_v45 = vmul.f32 0.99, %v1180_v34  ;;  %v294_v57 = vmul.f32 0.99, %v1181_v16  ;;  %547 = vst.msk [vmem:[%s759_s21 + $0x1c8] sm:$0xff] %vm489_vm0, %v482_v56  ;;  %v483_v58 = vadd.f32 %v419_v44, %v291_v6  ;;  %v484_v35 = vadd.f32 %v420_v33, %v292_v55  ;;  %v1182_v18 = vld [vmem:[#allocation18_spill] sm:$0xff] }
  0x67   : > { %v422_v36 = vmul.f32 0.01, %v358_v9  ;;  %v295_v59 = vmul.f32 0.99, %v1182_v18  ;;  %v359_v20 = vld [vmem:[%s727_s18 + $0x1f0] sm:$0xff]  ;;  %v360_v23 = vld [vmem:[%s727_s18 + $0x1f8] sm:$0xff] }
  0x68   : > { %v485_v14 = vadd.f32 %v421_v19, %v293_v45  ;;  %v423_v60 = vmul.f32 0.01, %v359_v20  ;;  %v1183_v37 = vld [vmem:[#allocation19_spill] sm:$0xff]  ;;  %v424_v26 = vmul.f32 0.01, %v360_v23  ;;  %548 = vst.msk [vmem:[%s759_s21 + $0x1d0] sm:$0xff] %vm489_vm0, %v483_v58 }
  0x69   : > { %v296_v38 = vmul.f32 0.99, %v1183_v37  ;;  %549 = vst.msk [vmem:[%s759_s21 + $0x1d8] sm:$0xff] %vm489_vm0, %v484_v35  ;;  %v486_v48 = vadd.f32 %v422_v36, %v294_v57 }
  0x6a   : > { %550 = vst.msk [vmem:[%s759_s21 + $0x1e0] sm:$0xff] %vm489_vm0, %v485_v14  ;;  %v487_v61 = vadd.f32 %v423_v60, %v295_v59 }
  0x6b   : > { %v488_v10 = vadd.f32 %v424_v26, %v296_v38  ;;  %551 = vst.msk [vmem:[%s759_s21 + $0x1e8] sm:$0xff] %vm489_vm0, %v486_v48 }
  0x6c   : > { %552 = vst.msk [vmem:[%s759_s21 + $0x1f0] sm:$0xff] %vm489_vm0, %v487_v61 }
  0x6d   : > { %553 = vst.msk [vmem:[%s759_s21 + $0x1f8] sm:$0xff] %vm489_vm0, %v488_v10 }
  0x6e PF: > { %s12_s9 = sadd.s32 1, %s649_s9  }
  0x6f   : > { %p9_p4 = scmp.ge.s32.totalorder %s12_s9, 4  }
  0x71   :  { %11 = sbr.rel (!%p9_p4) target bundleno = 1 (0x1), region = 61 }

// kernel: moco_forward.18
= control target key start
LH: loop header
LB: loop body
LE: loop exit
PB: predicated region body
PF: predicated region fallthrough
CT: control target
= control target key end

     0   :  { %vm51_vm0 = vcmask 261120   ;;  %s159_s0 = inlined_call_operand.vmem [shape: f32[64,32], index: 0, kind: input, shape index: {}, may-alias: {0,2}]   ;;  %s160_s1 = inlined_call_operand.vmem [shape: f32[64,32], index: 1, kind: input, shape index: {}]   ;;  %s161_s2 = inlined_call_operand.vmem [shape: f32[64,32], index: 2, kind: output, shape index: {}, may-alias: {0,2}]  }
   0x1   :  { %v11_v0 = vld [vmem:[%s159_s0] sm:$0xff]  ;;  %v12_v2 = vld [vmem:[%s159_s0 + $0x8] sm:$0xff]  ;;  %v13_v7 = vld [vmem:[%s159_s0 + $0x10] sm:$0xff] }
   0x2   :  { %v27_v1 = vld [vmem:[%s160_s1] sm:$0xff]  ;;  %v19_v3 = vmul.f32 0.99, %v11_v0  ;;  %v20_v5 = vmul.f32 0.99, %v12_v2  ;;  %v28_v6 = vld [vmem:[%s160_s1 + $0x8] sm:$0xff] }
   0x3   :  { %v35_v4 = vmul.f32 0.01, %v27_v1  ;;  %v29_v8 = vld [vmem:[%s160_s1 + $0x10] sm:$0xff]  ;;  %v36_v10 = vmul.f32 0.01, %v28_v6  ;;  %v14_v13 = vld [vmem:[%s159_s0 + $0x18] sm:$0xff] }
   0x4   :  { %v21_v11 = vmul.f32 0.99, %v13_v7  ;;  %v37_v12 = vmul.f32 0.01, %v29_v8  ;;  %v30_v14 = vld [vmem:[%s160_s1 + $0x18] sm:$0xff]  ;;  %v15_v15 = vld [vmem:[%s159_s0 + $0x20] sm:$0xff] }
   0x5   :  { %v43_v9 = vadd.f32 %v35_v4, %v19_v3  ;;  %v44_v16 = vadd.f32 %v36_v10, %v20_v5  ;;  %v22_v18 = vmul.f32 0.99, %v14_v13  ;;  %v38_v19 = vmul.f32 0.01, %v30_v14  ;;  %v31_v20 = vld [vmem:[%s160_s1 + $0x20] sm:$0xff]  ;;  %v32_v26 = vld [vmem:[%s160_s1 + $0x28] sm:$0xff] }
   0x6   :  { %v45_v17 = vadd.f32 %v37_v12, %v21_v11  ;;  %v23_v22 = vmul.f32 0.99, %v15_v15  ;;  %v39_v23 = vmul.f32 0.01, %v31_v20  ;;  %v33_v28 = vld [vmem:[%s160_s1 + $0x30] sm:$0xff]  ;;  %v34_v34 = vld [vmem:[%s160_s1 + $0x38] sm:$0xff] }
   0x7   :  { %52 = vst.msk [vmem:[%s161_s2] sm:$0xff] %vm51_vm0, %v43_v9  ;;  %v46_v25 = vadd.f32 %v38_v19, %v22_v18  ;;  %v40_v30 = vmul.f32 0.01, %v32_v26  ;;  %v41_v32 = vmul.f32 0.01, %v33_v28 }
   0x8   :  { %v47_v29 = vadd.f32 %v39_v23, %v23_v22  ;;  %v42_v38 = vmul.f32 0.01, %v34_v34 }
   0xe   :  { %v16_v21 = vld [vmem:[%s159_s0 + $0x28] sm:$0xff] }
   0xf   :  { %v24_v24 = vmul.f32 0.99, %v16_v21  ;;  %53 = vst.msk [vmem:[%s161_s2 + $0x8] sm:$0xff] %vm51_vm0, %v44_v16  ;;  %54 = vst.msk [vmem:[%s161_s2 + $0x10] sm:$0xff] %vm51_vm0, %v45_v17 }
  0x11   :  { %v48_v35 = vadd.f32 %v40_v30, %v24_v24 }
  0x16   :  { %v17_v27 = vld [vmem:[%s159_s0 + $0x30] sm:$0xff] }
  0x17   :  { %v25_v31 = vmul.f32 0.99, %v17_v27  ;;  %55 = vst.msk [vmem:[%s161_s2 + $0x18] sm:$0xff] %vm51_vm0, %v46_v25 }
  0x19   :  { %v49_v36 = vadd.f32 %v41_v32, %v25_v31 }
  0x1e   :  { %v18_v33 = vld [vmem:[%s159_s0 + $0x38] sm:$0xff] }
  0x1f   :  { %56 = vst.msk [vmem:[%s161_s2 + $0x20] sm:$0xff] %vm51_vm0, %v47_v29  ;;  %v26_v37 = vmul.f32 0.99, %v18_v33  ;;  %57 = vst.msk [vmem:[%s161_s2 + $0x28] sm:$0xff] %vm51_vm0, %v48_v35 }
  0x20   :  { %58 = vst.msk [vmem:[%s161_s2 + $0x30] sm:$0xff] %vm51_vm0, %v49_v36 }
  0x21   :  { %v50_v39 = vadd.f32 %v42_v38, %v26_v37 }
  0x23   :  { %59 = vst.msk [vmem:[%s161_s2 + $0x38] sm:$0xff] %vm51_vm0, %v50_v39 }

// kernel: moco_forward.19
= control target key start
LH: loop header
LB: loop body
LE: loop exit
PB: predicated region body
PF: predicated region fallthrough
CT: control target
= control target key end

     0   :  { %s1070_s15 = smov 0   ;;  %s1072_s16 = smov 0   ;;  %s1190_s0 = inlined_call_operand.vmem [shape: bf16[2,2,1024], index: 0, kind: input, shape index: {}]   ;;  %s1191_s1 = inlined_call_operand.vmem [shape: bf16[1024,64], index: 1, kind: input, shape index: {}]   ;;  %s1192_s2 = inlined_call_operand.vmem [shape: f32[1,64], index: 2, kind: input, shape index: {}]   ;;  %s1193_s3 = inlined_call_operand.vmem [shape: f32[1,64], index: 3, kind: input, shape index: {}]   ;;  %s1194_s4 = inlined_call_operand.vmem [shape: bf16[2,2,64], index: 4, kind: output, shape index: {}]  }
   0x1   :  { %s1074_s17 = smov 0   ;;  %s1076_s18 = smov 0  }
   0x2   :  { %s1078_s19 = smov 0  }
   0x3 LB: > { %s26_s20 = sadd.s32 1, %s1033_s17  ;;  %s33_s21 = sadd.s32 1, %s1037_s18  ;;  %s1041_s19 = sphi %s1078_s19, %s14_s19   ;;  %s1037_s18 = sphi %s1076_s18, %s1198_s18   ;;  %s1033_s17 = sphi %s1074_s17, %s1197_s17   ;;  %s1029_s16 = sphi %s1072_s16, %s1196_s16   ;;  %s1025_s15 = sphi %s1070_s15, %s1195_s15  }
   0x4   : > { %p27_p0 = scmp.ge.s32.totalorder %s26_s20, 2  ;;  %p839_p1 = scmp.ge.s32.totalorder %s1041_s19, 1 }
   0x5   : > { %p221_p2 = scmp.lt.s32.totalorder %s1041_s19, 5 }
   0x6   : > { %s1200_s20 = smov (%p27_p0, %s26_s20), 0  ;;  %s1202_s21 = smov (!%p27_p0, %s33_s21), %s1037_s18 }
   0x7   : > { %p222_p3 = pnand %p839_p1, %p221_p2  ;;  %p35_p4 = scmp.ge.s32.totalorder %s1202_s21, 2 }
   0x8   : > { %s840_s22 = sshll.u32 (!%p222_p3), %s1025_s15, 2  ;;  %p266_p5 = scmp.lt.s32.totalorder (!%p222_p3), %s1029_s16, 1 }
   0x9   : > { %s1204_s21 = smov (%p35_p4, %s1202_s21), 0  ;;  %225 = sbr.rel (%p222_p3) target bundleno = 330 (0x14a), region = 36 }
   0xa   : > { %p268_p6 = scmp.lt.s32.totalorder (!%p222_p3), %s840_s22, 7  ;;  %s842_s23 = sshll.u32 (!%p222_p3), %s1025_s15, 6 }
   0xb   : > { %p275_p7 = scmp.lt.s32.totalorder (!%p222_p3), %s842_s23, 127  ;;  %p844_p8 = scmp.ne.s32.totalorder (!%p222_p3), %s1025_s15, 0 }
   0xe   : > { %s1206_s16 = smov (!%p266_p5, %s1029_s16), 1  ;;  %s1208_s22 = smov (!%p268_p6, %s840_s22), 7 }
   0xf   : > { %s841_s24 = sshll.u32 %s1206_s16, 3  ;;  %s294_s28 = scalar_lea.vmem %s1194_s4, %s1206_s16 }
  0x10   : > { %s1107_s25 = sadd.s32 %s841_s24, %s1208_s22  ;;  %s1210_s23 = smov (!%p275_p7, %s842_s23), 127 }
  0x11   : > { %s272_s5 = scalar_lea.vmem %s1190_s0, %s1107_s25  ;;  %s843_s6 = sshll.u32 %s1210_s23, 2 }
  0x12   : > { %s1120_s9 = scalar_lea.vmem %s1191_s1, %s843_s6  ;;  %299 = sbr.rel (%p844_p8) target bundleno = 25 (0x19), region = 40 }
  0x17   : > { %vm300_vm0 = vcmask 517120   ;;  %v1043_v0 = vmov 0.0  }
  0x18   : > { %301 = vst.msk [vmem:[#allocation2] sm:$0x3] %vm300_vm0, %v1043_v0 }
  0x19 PF: > { %v969_v1 = vld [vmem:[%s1120_s9 + $0x78] sm:$0xff]   ;;  %v973_v5 = vld [vmem:[%s1120_s9 + $0x70] sm:$0xff]   ;;  %v977_v9 = vld [vmem:[%s1120_s9 + $0x68] sm:$0xff]   ;;  %v380_v31 = vlaneseq  ;;  %v1044_v35 = vmov 1966171168   ;;  %vm670_vm1 = vcmask 517120  }
  0x1a   : > { %v970_v2 = vld [vmem:[%s1120_s9 + $0xf8] sm:$0xff]   ;;  %883 = vmatprep.subr.bf16.mxu0 %v969_v1  ;;  %v974_v6 = vld [vmem:[%s1120_s9 + $0xf0] sm:$0xff]   ;;  %v978_v10 = vld [vmem:[%s1120_s9 + $0xe8] sm:$0xff]   ;;  %v378_v36 = vunpack.c.l.s4 %v1044_v35  ;;  %p878_p9 = scmp.ne.s32.totalorder %s1025_s15, 1 }
  0x1b   : > { %v971_v3 = vld [vmem:[%s1120_s9 + $0x38] sm:$0xff]   ;;  %905 = vmatprep.subr.bf16.mxu1 %v970_v2  ;;  %v975_v7 = vld [vmem:[%s1120_s9 + $0x30] sm:$0xff]   ;;  %v979_v11 = vld [vmem:[%s1120_s9 + $0x28] sm:$0xff]   ;;  %v381_v37 = vshrl.u32 %v380_v31, 7 }
  0x1c   : > { %v972_v4 = vld [vmem:[%s1120_s9 + $0xb8] sm:$0xff]   ;;  %884 = vmatpush3.bf16.msra.mxu0 %v971_v3  ;;  %v976_v8 = vld [vmem:[%s1120_s9 + $0xb0] sm:$0xff]   ;;  %v980_v12 = vld [vmem:[%s1120_s9 + $0xa8] sm:$0xff]   ;;  %v379_v39 = vunpack.c.0.s8 %v378_v36 }
  0x1d   : > { %906 = vmatpush3.bf16.msra.mxu1 %v972_v4  ;;  %885 = vmatprep.subr.bf16.mxu0 %v973_v5  ;;  %v981_v13 = vld [vmem:[%s1120_s9 + $0x60] sm:$0xff]   ;;  %v985_v17 = vld [vmem:[%s1120_s9 + $0x58] sm:$0xff]   ;;  %v989_v21 = vld [vmem:[%s1120_s9 + $0x50] sm:$0xff]  }
  0x1e   : > { %907 = vmatprep.subr.bf16.mxu1 %v974_v6  ;;  %v982_v14 = vld [vmem:[%s1120_s9 + $0xe0] sm:$0xff]   ;;  %v986_v18 = vld [vmem:[%s1120_s9 + $0xd8] sm:$0xff]   ;;  %v990_v22 = vld [vmem:[%s1120_s9 + $0xd0] sm:$0xff]   ;;  %v382_v40 = vsub.s32 %v379_v39, %v381_v37 }
  0x1f   : > { %v983_v15 = vld [vmem:[%s1120_s9 + $0x20] sm:$0xff]   ;;  %v987_v19 = vld [vmem:[%s1120_s9 + $0x18] sm:$0xff]   ;;  %v991_v23 = vld [vmem:[%s1120_s9 + $0x10] sm:$0xff]  }
  0x20   : > { %886 = vmatpush3.bf16.msra.mxu0 %v975_v7  ;;  %v984_v16 = vld [vmem:[%s1120_s9 + $0xa0] sm:$0xff]   ;;  %v988_v20 = vld [vmem:[%s1120_s9 + $0x98] sm:$0xff]   ;;  %v992_v24 = vld [vmem:[%s1120_s9 + $0x90] sm:$0xff]  }
  0x21   : > { %908 = vmatpush3.bf16.msra.mxu1 %v976_v8  ;;  %887 = vmatprep.subr.bf16.mxu0 %v977_v9  ;;  %v993_v25 = vld [vmem:[%s1120_s9 + $0x48] sm:$0xff]   ;;  %v997_v29 = vld [vmem:[%s1120_s9 + $0x40] sm:$0xff]  }
  0x22   : > { %909 = vmatprep.subr.bf16.mxu1 %v978_v10  ;;  %v994_v26 = vld [vmem:[%s1120_s9 + $0xc8] sm:$0xff]   ;;  %v998_v30 = vld [vmem:[%s1120_s9 + $0xc0] sm:$0xff]  }
  0x23   : > { %v995_v27 = vld [vmem:[%s1120_s9 + $0x8] sm:$0xff]   ;;  %v999_v32 = vld [vmem:[%s1120_s9] sm:$0xff]  }
  0x24   : > { %888 = vmatpush3.bf16.msra.mxu0 %v979_v11  ;;  %v996_v28 = vld [vmem:[%s1120_s9 + $0x88] sm:$0xff]   ;;  %v1000_v33 = vld [vmem:[%s1120_s9 + $0x80] sm:$0xff]  }
  0x25   : > { %910 = vmatpush3.bf16.msra.mxu1 %v980_v12  ;;  %889 = vmatprep.subr.bf16.mxu0 %v981_v13  ;;  %v845_v34 = vld.sshfl [vmem:[%s272_s5] sm:$0x33 pattern:$0x75316420] }
  0x26   : > { %911 = vmatprep.subr.bf16.mxu1 %v982_v14  ;;  %v376_v38 = vcombine.high %v845_v34, %v845_v34  ;;  %v383_v42 = vrot.slane %v845_v34, %v382_v40  ;;  %v302_v52 = vld [vmem:[#allocation2] sm:$0x3] }
  0x28   : > { %890 = vmatpush3.bf16.msra.mxu0 %v983_v15  ;;  %v390_v41 = vrot.slane %v376_v38, %v382_v40  ;;  %v391_v44 = vcombine.high %v383_v42, %v383_v42 }
  0x29   : > { %912 = vmatpush3.bf16.msra.mxu1 %v984_v16  ;;  %891 = vmatprep.subr.bf16.mxu0 %v985_v17 }
  0x2a   : > { %913 = vmatprep.subr.bf16.mxu1 %v986_v18  ;;  %621 = vmatprep.mubr.bf16.mxu0 %v390_v41  ;;  %v392_v43 = vcombine.high %v390_v41, %v390_v41 }
  0x2c   : > { %892 = vmatpush3.bf16.msra.mxu0 %v987_v19  ;;  %661 = vmatprep.mubr.bf16.mxu1 %v392_v43 }
  0x2d   : > { %914 = vmatpush3.bf16.msra.mxu1 %v988_v20  ;;  %893 = vmatprep.subr.bf16.mxu0 %v989_v21 }
  0x2e   : > { %915 = vmatprep.subr.bf16.mxu1 %v990_v22 }
  0x30   : > { %894 = vmatpush3.bf16.msra.mxu0 %v991_v23 }
  0x31   : > { %916 = vmatpush3.bf16.msra.mxu1 %v992_v24  ;;  %895 = vmatprep.subr.bf16.mxu0 %v993_v25 }
  0x32   : > { %917 = vmatprep.subr.bf16.mxu1 %v994_v26 }
  0x34   : > { %896 = vmatpush3.bf16.msra.mxu0 %v995_v27 }
  0x35   : > { %918 = vmatpush3.bf16.msra.mxu1 %v996_v28  ;;  %897 = vmatprep.subr.bf16.mxu0 %v997_v29 }
  0x36   : > { %919 = vmatprep.subr.bf16.mxu1 %v998_v30 }
  0x38   : > { %898 = vmatpush3.bf16.msra.mxu0 %v999_v32 }
  0x39   : > { %920 = vmatpush3.bf16.msra.mxu1 %v1000_v33 }
  0x3b   : > { %622 = vmatmul.mubr.bf16.vlgmr.msra.gmra.mxu0 %v383_v42 }
  0x3c   : > { %662 = vmatmul.mubr.bf16.vlgmr.msra.gmra.mxu1 %v391_v44 }
  0xfb   : > { %v899_v45 = vpop.f32.mrf.mxu0 }
  0xfc   : > { %v921_v46 = vpop.f32.mrf.mxu1 }
  0xfd   : > { %v900_v47 = vpop.f32.mrf.mxu0 }
  0xfe   : > { %v901_v48 = vadd.f32 %v900_v47, %v899_v45  ;;  %v922_v49 = vpop.f32.mrf.mxu1 }
  0xff   : > { %v902_v50 = vpop.f32.mrf.mxu0  ;;  %v923_v51 = vadd.f32 %v922_v49, %v921_v46 }
 0x100   : > { %v924_v53 = vpop.f32.mrf.mxu1 }
 0x101   : > { %v903_v54 = vpop.f32.mrf.mxu0  ;;  %v664_v55 = vadd.f32 %v923_v51, %v901_v48  ;;  %675 = sbr.rel (%p878_p9) target bundleno = 330 (0x14a), region = 44 }
 0x102   : > { %v925_v56 = vpop.f32.mrf.mxu1 }
 0x103   : > { %v669_v57 = vadd.f32 %v664_v55, %v302_v52 }
 0x105   : > { %671 = vst.msk [vmem:[#allocation2] sm:$0x3] %vm670_vm1, %v669_v57 }
 0x106   : > { %v879_v15 = vld [vmem:[%s1192_s2] ss:$0 sm:$0xff]  ;;  %vm717_vm2 = vcmask 516096  }
 0x107   : > { %v880_v17 = vld [vmem:[%s1193_s3] ss:$0 sm:$0xff] }
 0x10c   : > { %v676_v58 = vld [vmem:[#allocation2] sm:$0x3] }
 0x10d   : > { %v677_v59 = vsel %vm670_vm1, %v676_v58, 0.0 }
 0x10e   : > { %v678_v60 = vrot.slane %v677_v59, 4 }
 0x110   : > { %v679_v61 = vadd.f32 %v678_v60, %v677_v59 }
 0x112   : > { %v680_v62 = vrot.slane %v679_v61, 2 }
 0x114   : > { %v681_v63 = vadd.f32 %v680_v62, %v679_v61 }
 0x116   : > { %v682_v0 = vrot.slane %v681_v63, 1 }
 0x118   : > { %v683_v1 = vadd.f32 %v682_v0, %v681_v63 }
 0x11a   : > { %v685_v2 = vmul.f32 0.5, %v683_v1 }
 0x11c   : > { %v686_v3 = vsub.f32 %v676_v58, %v685_v2 }
 0x11e   : > { %v687_v4 = vmul.f32 %v686_v3, %v686_v3 }
 0x120   : > { %v688_v5 = vsel %vm670_vm1, %v687_v4, 0.0 }
 0x121   : > { %v689_v6 = vrot.slane %v688_v5, 4 }
 0x123   : > { %v690_v7 = vadd.f32 %v689_v6, %v688_v5 }
 0x125   : > { %v691_v8 = vrot.slane %v690_v7, 2 }
 0x127   : > { %v692_v9 = vadd.f32 %v691_v8, %v690_v7 }
 0x129   : > { %v693_v10 = vrot.slane %v692_v9, 1 }
 0x12b   : > { %v694_v11 = vadd.f32 %v693_v10, %v692_v9 }
 0x12d   : > { %v695_v12 = vmul.f32 0.5, %v694_v11 }
 0x12f   : > { %v696_v13 = vadd.f32 1e-05, %v695_v12 }
 0x131   : > { %1001 = vrsqrt.f32 %v696_v13 }
 0x13e   : > { %v1002_v14 = vpop.eup %1001 }
 0x13f   : > { %v698_v16 = vmul.f32 %v1002_v14, %v686_v3 }
 0x141   : > { %v706_v18 = vmul.f32 %v879_v15, %v698_v16 }
 0x143   : > { %v714_v19 = vadd.f32 %v880_v17, %v706_v18 }
 0x145   : > { %v715_v20 = vmax.f32 %v714_v19, 0.0 }
 0x147   : > { %v716_v21 = vpack.c.bf16 %v715_v20, %v715_v20 }
 0x149   : > { %718 = vst.msk [vmem:[%s294_s28] sm:$0x1] %vm717_vm2, %v716_v21 }
 0x14a PF: > { %s14_s19 = sadd.s32 1, %s1041_s19   ;;  %s1195_s15 = smov %s1033_s17 }
 0x14b   : > { %p11_p10 = scmp.ge.s32.totalorder %s14_s19, 6   ;;  %s1196_s16 = smov %s1037_s18 }
 0x14c   : > { %s1197_s17 = smov %s1200_s20  ;;  %s1198_s18 = smov %s1204_s21 }
 0x14d   :  { %13 = sbr.rel (!%p11_p10) target bundleno = 3 (0x3), region = 83 }

// kernel: moco_forward.20
= control target key start
LH: loop header
LB: loop body
LE: loop exit
PB: predicated region body
PF: predicated region fallthrough
CT: control target
= control target key end

     0   :  { %s519_s9 = smov 0   ;;  %s521_s10 = smov 0   ;;  %s573_s0 = inlined_call_operand.vmem [shape: bf16[2,2,64], index: 0, kind: input, shape index: {}]   ;;  %s574_s1 = inlined_call_operand.vmem [shape: bf16[64,32], index: 1, kind: input, shape index: {}]   ;;  %s575_s2 = inlined_call_operand.vmem [shape: f32[2,2,32], index: 2, kind: output, shape index: {}]  }
   0x1   :  { %s523_s11 = smov 0  }
   0x2 LB: > { %s31_s12 = sadd.s32 1, %s496_s10  ;;  %p420_p0 = scmp.ge.s32.totalorder %s500_s11, 1  ;;  %s500_s11 = sphi %s523_s11, %s12_s11   ;;  %s496_s10 = sphi %s521_s10, %s577_s10   ;;  %s492_s9 = sphi %s519_s9, %s576_s9  }
   0x3   : > { %p33_p1 = scmp.ge.s32.totalorder %s31_s12, 2  ;;  %p152_p2 = scmp.lt.s32.totalorder %s500_s11, 3 }
   0x5   : > { %s579_s12 = smov (%p33_p1, %s31_s12), 0  ;;  %p153_p3 = pnand %p420_p0, %p152_p2 }
   0x6   : > { %p185_p4 = scmp.lt.s32.totalorder (!%p153_p3), %s492_s9, 1 }
   0x7   : > { %156 = sbr.rel (%p153_p3) target bundleno = 285 (0x11d), region = 28 }
   0xc   : > { %v472_v0 = vld [vmem:[%s574_s1 + $0x18] sm:$0xff]   ;;  %v502_v1 = vmov 0.0   ;;  %v473_v2 = vld [vmem:[%s574_s1 + $0x10] sm:$0xff]   ;;  %vm503_vm0 = vmmov 0   ;;  %vm212_vm1 = vcmask 254976   ;;  %v474_v3 = vld [vmem:[%s574_s1 + $0x8] sm:$0xff]  }
   0xd   : > { %434 = vmatprep.subr.bf16.mxu0 %v502_v1  ;;  %442 = vmatprep.mubr.msk.bf16.mxu0 %vm503_vm0, %v502_v1  ;;  %213 = vst.msk [vmem:[#allocation2] sm:$0x3] %vm212_vm1, %v502_v1  ;;  %s581_s9 = smov (!%p185_p4, %s492_s9), 1  ;;  %v475_v4 = vld [vmem:[%s574_s1] sm:$0xff]   ;;  %vm248_vm2 = vcmask 523264  }
   0xe   : > { %435 = vmatpush3.bf16.msra.mxu0 %v472_v0  ;;  %s190_s23 = scalar_lea.vmem %s573_s0, %s581_s9  ;;  %s421_s24 = sshll.u32 %s581_s9, 1 }
   0xf   : > { %436 = vmatprep.subr.bf16.mxu0 %v502_v1  ;;  %v215_v5 = vld [vmem:[%s190_s23] sm:$0x1]  ;;  %s206_s27 = scalar_lea.vmem %s575_s2, %s421_s24 }
  0x12   : > { %437 = vmatpush3.bf16.msra.mxu0 %v473_v2 }
  0x13   : > { %438 = vmatprep.subr.bf16.mxu0 %v502_v1 }
  0x14   : > { %v214_v6 = vld [vmem:[#allocation2] sm:$0x3] }
  0x16   : > { %439 = vmatpush3.bf16.msra.mxu0 %v474_v3 }
  0x17   : > { %440 = vmatprep.subr.bf16.mxu0 %v502_v1 }
  0x1a   : > { %441 = vmatpush3.bf16.msra.mxu0 %v475_v4 }
  0x1d   : > { %443 = vmatmul.mubr.msk.bf16.vlgmr.msra.gmra.mxu0 %vm248_vm2, %v215_v5 }
  0xdd   : > { %v286_v7 = vpop.f32.mrf.mxu0 }
  0xde   : > { %v292_v8 = vadd.f32 %v286_v7, %v214_v6 }
  0xdf   : > { %v444_v9 = vpop.f32.mrf.mxu0 }
  0xe0   : > { %294 = vst.msk [vmem:[#allocation2] sm:$0x3] %vm212_vm1, %v292_v8 }
  0xe1   : > { %v289_v10 = vpop.f32.mrf.mxu0 }
  0xe3   : > { %v445_v11 = vpop.f32.mrf.mxu0 }
  0xe7   : > { %v298_v12 = vld [vmem:[#allocation2] sm:$0x3] }
  0xe8   : > { %v299_v13 = vsel %vm212_vm1, %v298_v12, 0.0 }
  0xe9   : > { %v300_v14 = vrot.slane %v299_v13, 4 }
  0xeb   : > { %v301_v15 = vadd.f32 %v300_v14, %v299_v13 }
  0xed   : > { %v302_v16 = vrot.slane %v301_v15, 2 }
  0xef   : > { %v303_v17 = vadd.f32 %v302_v16, %v301_v15 }
  0xf1   : > { %v304_v18 = vrot.slane %v303_v17, 1 }
  0xf3   : > { %v305_v19 = vadd.f32 %v304_v18, %v303_v17 }
  0xf5   : > { %v307_v20 = vmul.f32 0.5, %v305_v19 }
  0xf7   : > { %v308_v21 = vsub.f32 %v298_v12, %v307_v20 }
  0xf9   : > { %v309_v22 = vmul.f32 %v308_v21, %v308_v21 }
  0xfb   : > { %v310_v23 = vsel %vm212_vm1, %v309_v22, 0.0 }
  0xfc   : > { %v311_v24 = vrot.slane %v310_v23, 4 }
  0xfe   : > { %v312_v25 = vadd.f32 %v311_v24, %v310_v23 }
 0x100   : > { %v313_v26 = vrot.slane %v312_v25, 2 }
 0x102   : > { %v314_v27 = vadd.f32 %v313_v26, %v312_v25 }
 0x104   : > { %v315_v28 = vrot.slane %v314_v27, 1 }
 0x106   : > { %v316_v29 = vadd.f32 %v315_v28, %v314_v27 }
 0x108   : > { %v317_v30 = vmul.f32 0.5, %v316_v29 }
 0x10a   : > { %v318_v31 = vadd.f32 1e-05, %v317_v30 }
 0x10c   : > { %476 = vrsqrt.f32 %v318_v31 }
 0x119   : > { %v477_v32 = vpop.eup %476 }
 0x11a   : > { %v320_v33 = vmul.f32 %v477_v32, %v308_v21 }
 0x11c   : > { %321 = vst.msk [vmem:[%s206_s27] sm:$0x3] %vm212_vm1, %v320_v33 }
 0x11d PF: > { %s12_s11 = sadd.s32 1, %s500_s11   ;;  %s576_s9 = smov %s496_s10 }
 0x11e   : > { %p9_p5 = scmp.ge.s32.totalorder %s12_s11, 4   ;;  %s577_s10 = smov %s579_s12 }
 0x120   :  { %11 = sbr.rel (!%p9_p5) target bundleno = 2 (0x2), region = 69 }

// kernel: moco_forward.13
= control target key start
LH: loop header
LB: loop body
LE: loop exit
PB: predicated region body
PF: predicated region fallthrough
CT: control target
= control target key end

     0   :  { %s623_s15 = smov 0   ;;  %s625_s16 = smov 0   ;;  %s676_s0 = inlined_call_operand.vmem [shape: bf16[2,2,32], index: 0, kind: input, shape index: {}]   ;;  %s677_s1 = inlined_call_operand.vmem [shape: bf16[32,64], index: 1, kind: input, shape index: {}]   ;;  %s678_s2 = inlined_call_operand.vmem [shape: f32[1,64], index: 2, kind: input, shape index: {}]   ;;  %s679_s3 = inlined_call_operand.vmem [shape: f32[1,64], index: 3, kind: input, shape index: {}]   ;;  %s680_s4 = inlined_call_operand.vmem [shape: bf16[2,2,64], index: 4, kind: output, shape index: {}]  }
   0x1   :  { %s627_s17 = smov 0  }
   0x2 LB: > { %s33_s18 = sadd.s32 1, %s590_s16  ;;  %p523_p0 = scmp.ge.s32.totalorder %s594_s17, 1  ;;  %s594_s17 = sphi %s627_s17, %s14_s17   ;;  %s590_s16 = sphi %s625_s16, %s682_s16   ;;  %s586_s15 = sphi %s623_s15, %s681_s15  }
   0x3   : > { %p35_p1 = scmp.ge.s32.totalorder %s33_s18, 2  ;;  %p218_p2 = scmp.lt.s32.totalorder %s594_s17, 3 }
   0x5   : > { %s684_s18 = smov (%p35_p1, %s33_s18), 0  ;;  %p219_p3 = pnand %p523_p0, %p218_p2 }
   0x6   : > { %p260_p4 = scmp.lt.s32.totalorder (!%p219_p3), %s586_s15, 1 }
   0x7   : > { %222 = sbr.rel (%p219_p3) target bundleno = 285 (0x11d), region = 36 }
   0xc   : > { %vm292_vm0 = vcmask 517120   ;;  %v596_v0 = vmov 0.0   ;;  %v568_v1 = vld [vmem:[%s677_s1 + $0x8] sm:$0xff]   ;;  %vm597_vm1 = vmmov 0   ;;  %v569_v2 = vld [vmem:[%s677_s1] sm:$0xff]   ;;  %s686_s15 = smov (!%p260_p4, %s586_s15), 1 }
   0xd   : > { %293 = vst.msk [vmem:[#allocation2] sm:$0x3] %vm292_vm0, %v596_v0  ;;  %534 = vmatprep.subr.bf16.mxu0 %v596_v0  ;;  %538 = vmatprep.mubr.msk.bf16.mxu0 %vm597_vm1, %v596_v0  ;;  %s265_s25 = scalar_lea.vmem %s676_s0, %s686_s15  ;;  %vm312_vm2 = vcmask 261120   ;;  %v527_v31 = vld [vmem:[%s678_s2] ss:$0 sm:$0xff]  ;;  %s286_s6 = scalar_lea.vmem %s680_s4, %s686_s15  ;;  %vm403_vm3 = vcmask 516096  }
   0xe   : > { %535 = vmatpush3.bf16.msra.mxu0 %v568_v1  ;;  %v295_v3 = vld [vmem:[%s265_s25] sm:$0x1] }
   0xf   : > { %536 = vmatprep.subr.bf16.mxu0 %v596_v0  ;;  %v528_v33 = vld [vmem:[%s679_s3] ss:$0 sm:$0xff] }
  0x12   : > { %537 = vmatpush3.bf16.msra.mxu0 %v569_v2 }
  0x14   : > { %v294_v4 = vld [vmem:[#allocation2] sm:$0x3] }
  0x15   : > { %539 = vmatmul.mubr.msk.bf16.vlgmr.msra.gmra.mxu0 %vm312_vm2, %v295_v3 }
  0xd5   : > { %v350_v5 = vpop.f32.mrf.mxu0 }
  0xd6   : > { %v356_v6 = vadd.f32 %v350_v5, %v294_v4 }
  0xd7   : > { %v540_v7 = vpop.f32.mrf.mxu0 }
  0xd8   : > { %358 = vst.msk [vmem:[#allocation2] sm:$0x3] %vm292_vm0, %v356_v6 }
  0xd9   : > { %v353_v8 = vpop.f32.mrf.mxu0 }
  0xdb   : > { %v541_v9 = vpop.f32.mrf.mxu0 }
  0xdf   : > { %v362_v10 = vld [vmem:[#allocation2] sm:$0x3] }
  0xe0   : > { %v363_v11 = vsel %vm292_vm0, %v362_v10, 0.0 }
  0xe1   : > { %v364_v12 = vrot.slane %v363_v11, 4 }
  0xe3   : > { %v365_v13 = vadd.f32 %v364_v12, %v363_v11 }
  0xe5   : > { %v366_v14 = vrot.slane %v365_v13, 2 }
  0xe7   : > { %v367_v15 = vadd.f32 %v366_v14, %v365_v13 }
  0xe9   : > { %v368_v16 = vrot.slane %v367_v15, 1 }
  0xeb   : > { %v369_v17 = vadd.f32 %v368_v16, %v367_v15 }
  0xed   : > { %v371_v18 = vmul.f32 0.5, %v369_v17 }
  0xef   : > { %v372_v19 = vsub.f32 %v362_v10, %v371_v18 }
  0xf1   : > { %v373_v20 = vmul.f32 %v372_v19, %v372_v19 }
  0xf3   : > { %v374_v21 = vsel %vm292_vm0, %v373_v20, 0.0 }
  0xf4   : > { %v375_v22 = vrot.slane %v374_v21, 4 }
  0xf6   : > { %v376_v23 = vadd.f32 %v375_v22, %v374_v21 }
  0xf8   : > { %v377_v24 = vrot.slane %v376_v23, 2 }
  0xfa   : > { %v378_v25 = vadd.f32 %v377_v24, %v376_v23 }
  0xfc   : > { %v379_v26 = vrot.slane %v378_v25, 1 }
  0xfe   : > { %v380_v27 = vadd.f32 %v379_v26, %v378_v25 }
 0x100   : > { %v381_v28 = vmul.f32 0.5, %v380_v27 }
 0x102   : > { %v382_v29 = vadd.f32 1e-05, %v381_v28 }
 0x104   : > { %570 = vrsqrt.f32 %v382_v29 }
 0x111   : > { %v571_v30 = vpop.eup %570 }
 0x112   : > { %v384_v32 = vmul.f32 %v571_v30, %v372_v19 }
 0x114   : > { %v392_v34 = vmul.f32 %v527_v31, %v384_v32 }
 0x116   : > { %v400_v35 = vadd.f32 %v528_v33, %v392_v34 }
 0x118   : > { %v401_v36 = vmax.f32 %v400_v35, 0.0 }
 0x11a   : > { %v402_v37 = vpack.c.bf16 %v401_v36, %v401_v36 }
 0x11c   : > { %404 = vst.msk [vmem:[%s286_s6] sm:$0x1] %vm403_vm3, %v402_v37 }
 0x11d PF: > { %s14_s17 = sadd.s32 1, %s594_s17   ;;  %s681_s15 = smov %s590_s16 }
 0x11e   : > { %p11_p5 = scmp.ge.s32.totalorder %s14_s17, 4   ;;  %s682_s16 = smov %s684_s18 }
 0x120   :  { %13 = sbr.rel (!%p11_p5) target bundleno = 2 (0x2), region = 83 }

// kernel: moco_forward.21
= control target key start
LH: loop header
LB: loop body
LE: loop exit
PB: predicated region body
PF: predicated region fallthrough
CT: control target
= control target key end

     0   :  { %vm18_vm0 = vcmask 254976   ;;  %s367_s0 = inlined_call_operand.vmem [shape: f32[2,2,32], index: 0, kind: input, shape index: {}]   ;;  %s368_s1 = inlined_call_operand.vmem [shape: f32[2,2,32], index: 1, kind: input, shape index: {}]   ;;  %s369_s2 = inlined_call_operand.hbm [shape: f32[1,1,1], index: 2, kind: output, shape index: {}]  }
   0x1   :  { %v14_v0 = vld [vmem:[%s368_s1] sm:$0x3]  ;;  %v15_v4 = vld [vmem:[%s368_s1 + $0x2] sm:$0x3] }
   0x2   :  { %v12_v1 = vld [vmem:[%s367_s0] sm:$0x3]  ;;  %v31_v2 = vmul.f32 %v14_v0, %v14_v0  ;;  %v13_v5 = vld [vmem:[%s367_s0 + $0x2] sm:$0x3] }
   0x3   :  { %v16_v3 = vmul.f32 %v12_v1, %v12_v1 }
   0x4   :  { %7 = vsyncpa [#allocation3], 0  ;;  %v32_v6 = vmul.f32 %v15_v4, %v15_v4  ;;  %v17_v7 = vmul.f32 %v13_v5, %v13_v5  ;;  %v33_v8 = vsel %vm18_vm0, %v31_v2, 0.0  ;;  %v324_v12 = vmov 0.0   ;;  %s326_s0 = smov [#allocation2]  }
   0x5   :  { %v19_v9 = vsel %vm18_vm0, %v16_v3, 0.0  ;;  %34 = vadd.xlane.f32.xlu0 %v33_v8  ;;  %273 = vmatprep.subr.mxu0 %v324_v12  ;;  %vm325_vm1 = vmmov 0   ;;  %vm53_vm2 = vcmask 261120   ;;  %vm206_vm3 = vcmask 9216   ;;  %s257_s1 = sshll.u32 %s326_s0, 4  ;;  %s258_s1 = int_to_ptr.vmem [resolvable:$true] %s257_s1 }
   0x6   :  { %20 = vadd.xlane.f32.xlu1 %v19_v9  ;;  %v36_v10 = vsel %vm18_vm0, %v32_v6, 0.0  ;;  %v22_v11 = vsel %vm18_vm0, %v17_v7, 0.0  ;;  %278 = vmatprep.subr.mxu1 %v324_v12  ;;  %vm233_vm4 = vcmask 1041408   ;;  %vm249_vm5 = vcmask 0   ;;  %s302_s17 = scalar_lea.vmem %s258_s1, 16  ;;  %s306_s18 = scalar_lea.vmem %s258_s1, 32 }
   0x7   :  { %275 = vmatprep.mubr.msk.f32.mxu0 %vm325_vm1, %v324_v12  ;;  %280 = vmatprep.mubr.msk.f32.mxu1 %vm325_vm1, %v324_v12  ;;  %p303_p0 = scmp.ne.s32.totalorder %s258_s1, %s302_s17  ;;  %p307_p1 = scmp.lt.s32.totalorder %s258_s1, %s258_s1 }
   0x8   :  { %p308_p2 = scmp.lt.s32.totalorder %s306_s18, %s302_s17 }
   0x9   :  { %37 = vadd.xlane.f32.xlu0 %v36_v10 }
   0xa   :  { %23 = vadd.xlane.f32.xlu1 %v22_v11  ;;  %p309_p3 = por %p308_p2, %p307_p1 }
   0xc   :  { %p310_p4 = pnand %p309_p3, %p303_p0 }
  0x8e   :  { %v35_v13 = vpop.xlane.xlu0 %34 }
  0x8f   :  { %v21_v14 = vpop.xlane.xlu1 %20  ;;  %v39_v15 = vadd.f32 1e-24, %v35_v13 }
  0x90   :  { %v25_v16 = vadd.f32 1e-24, %v21_v14 }
  0x91   :  { %286 = vrsqrt.f32 %v39_v15 }
  0x92   :  { %288 = vrsqrt.f32 %v25_v16  ;;  %v38_v17 = vpop.xlane.xlu0 %37 }
  0x93   :  { %v24_v18 = vpop.xlane.xlu1 %23  ;;  %v40_v19 = vadd.f32 1e-24, %v38_v17 }
  0x94   :  { %v26_v20 = vadd.f32 1e-24, %v24_v18 }
  0x95   :  { %290 = vrsqrt.f32 %v40_v19 }
  0x96   :  { %292 = vrsqrt.f32 %v26_v20 }
  0x9e   :  { %v287_v21 = vpop.eup %286 }
  0x9f   :  { %v289_v22 = vpop.eup %288  ;;  %v43_v23 = vmul.f32 %v287_v21, %v14_v0 }
  0xa0   :  { %v29_v24 = vmul.f32 %v289_v22, %v12_v1 }
  0xa1   :  { %274 = vmatpush3.xpose.msk.msra.mxu0 %vm53_vm2, %v43_v23 }
  0xa2   :  { %v291_v25 = vpop.eup %290  ;;  %v45_v26 = vmul.f32 %v43_v23, %v29_v24 }
  0xa3   :  { %v293_v27 = vpop.eup %292  ;;  %v44_v28 = vmul.f32 %v291_v25, %v15_v4 }
  0xa4   :  { %276 = vmatmul.mubr.msk.f32.vlgmr.msra.gmra.mxu0 %vm53_vm2, %v29_v24  ;;  %v30_v29 = vmul.f32 %v293_v27, %v13_v5  ;;  %v47_v46 = vsel %vm18_vm0, %v45_v26, 0.0 }
  0xa5   :  { %279 = vmatpush3.xpose.msk.msra.mxu1 %vm53_vm2, %v44_v28 }
  0xa6   :  { %v46_v30 = vmul.f32 %v44_v28, %v30_v29 }
  0xa8   :  { %281 = vmatmul.mubr.msk.f32.vlgmr.msra.gmra.mxu1 %vm53_vm2, %v30_v29  ;;  %v50_v48 = vsel %vm18_vm0, %v46_v30, 0.0 }
 0x164   :  { %v126_v31 = vpop.f32.mrf.mxu0 }
 0x165   :  { %v207_v32 = vsel %vm206_vm3, %v126_v31, -inf }
 0x166   :  { %208 = vmax.xlane.f32.xlu0 %v207_v32  ;;  %v277_v33 = vpop.f32.mrf.mxu0 }
 0x168   :  { %v202_v34 = vpop.f32.mrf.mxu1 }
 0x169   :  { %v210_v35 = vsel %vm206_vm3, %v202_v34, -inf }
 0x16a   :  { %211 = vmax.xlane.f32.xlu1 %v210_v35  ;;  %v282_v36 = vpop.f32.mrf.mxu1 }
 0x1ef   :  { %v209_v37 = vpop.xlane.xlu0 %208 }
 0x1f0   :  { %v213_v38 = vsub.f32 %v126_v31, %v209_v37 }
 0x1f2   :  { %v215_v39 = vmul.f32 1.442695, %v213_v38 }
 0x1f3   :  { %v212_v40 = vpop.xlane.xlu1 %211 }
 0x1f4   :  { %294 = vpow2.f32 %v215_v39  ;;  %v214_v41 = vsub.f32 %v202_v34, %v212_v40 }
 0x1f6   :  { %v217_v42 = vmul.f32 1.442695, %v214_v41 }
 0x1f8   :  { %296 = vpow2.f32 %v217_v42 }
 0x201   :  { %v295_v43 = vpop.eup %294 }
 0x202   :  { %v219_v44 = vsel %vm206_vm3, %v295_v43, 0.0 }
 0x203   :  { %220 = vadd.xlane.f32.xlu0 %v219_v44 }
 0x205   :  { %v297_v45 = vpop.eup %296 }
 0x206   :  { %v222_v47 = vsel %vm206_vm3, %v297_v45, 0.0 }
 0x207   :  { %48 = vadd.xlane.f32.xlu0 %v47_v46  ;;  %223 = vadd.xlane.f32.xlu1 %v222_v47 }
 0x20b   :  { %51 = vadd.xlane.f32.xlu1 %v50_v48 }
 0x28c   :  { %v221_v49 = vpop.xlane.xlu0 %220 }
 0x28d   :  { %298 = vlog2.f32 %v221_v49 }
 0x290   :  { %v224_v50 = vpop.xlane.xlu1 %223  ;;  %v49_v55 = vpop.xlane.xlu0 %48 }
 0x291   :  { %300 = vlog2.f32 %v224_v50 }
 0x294   :  { %v52_v61 = vpop.xlane.xlu1 %51 }
 0x29a   :  { %v299_v51 = vpop.eup %298 }
 0x29b   :  { %v226_v52 = vmul.f32 0.6931472, %v299_v51 }
 0x29d   :  { %v229_v53 = vadd.f32 %v226_v52, %v209_v37 }
 0x29e   :  { %v301_v54 = vpop.eup %300 }
 0x29f   :  { %v231_v56 = vsub.f32 %v229_v53, %v49_v55  ;;  %v228_v57 = vmul.f32 0.6931472, %v301_v54 }
 0x2a1   :  { %v234_v58 = vsel %vm233_vm4, %v231_v56, 0.0  ;;  %v230_v59 = vadd.f32 %v228_v57, %v212_v40 }
 0x2a2   :  { %v235_v60 = vrot.slane %v234_v58, 4 }
 0x2a3   :  { %v232_v62 = vsub.f32 %v230_v59, %v52_v61 }
 0x2a4   :  { %v236_v63 = vadd.f32 %v235_v60, %v234_v58 }
 0x2a5   :  { %v241_v0 = vsel %vm233_vm4, %v232_v62, 0.0 }
 0x2a6   :  { %v237_v1 = vrot.slane %v236_v63, 2  ;;  %v242_v2 = vrot.slane %v241_v0, 4 }
 0x2a8   :  { %v238_v3 = vadd.f32 %v237_v1, %v236_v63  ;;  %v243_v4 = vadd.f32 %v242_v2, %v241_v0 }
 0x2aa   :  { %v244_v5 = vrot.slane %v243_v4, 2  ;;  %v239_v6 = vrot.slane %v238_v3, 1 }
 0x2ac   :  { %v245_v7 = vadd.f32 %v244_v5, %v243_v4  ;;  %v240_v9 = vadd.f32 %v239_v6, %v238_v3 }
 0x2ae   :  { %v246_v8 = vrot.slane %v245_v7, 1 }
 0x2b0   :  { %v247_v10 = vadd.f32 %v246_v8, %v245_v7 }
 0x2b2   :  { %v248_v11 = vadd.f32 %v247_v10, %v240_v9 }
 0x2b4   :  { %250 = vst.msk [vmem:[#allocation2] sm:$0x1] %vm249_vm5, %v248_v11 }
 0x2b5   :  { %313 = shalt.err (!%p310_p4)
}
 0x2b6   :  { %260 = dma.vmem_to_hbm [thread:$0]  %s258_s1, 16, %s369_s2, [#allocation3]  }
 0x2b7   :  { %322 = dma.done.wait [#allocation3], 16  }
 0x2b8   :  { %323 = vsyncadd [#allocation3], 4294967280 }
 0x2b9   :  { %264 = vsyncpa [#allocation3], 1 }

// kernel: moco_forward.14
= control target key start
LH: loop header
LB: loop body
LE: loop exit
PB: predicated region body
PF: predicated region fallthrough
CT: control target
= control target key end

     0   :  { %s495_s9 = smov 0   ;;  %s497_s10 = smov 0   ;;  %s543_s0 = inlined_call_operand.vmem [shape: bf16[2,2,64], index: 0, kind: input, shape index: {}]   ;;  %s544_s1 = inlined_call_operand.vmem [shape: bf16[64,32], index: 1, kind: input, shape index: {}]   ;;  %s545_s2 = inlined_call_operand.vmem [shape: f32[2,2,32], index: 2, kind: output, shape index: {}]  }
   0x1   :  { %s499_s11 = smov 0  }
   0x2 LB: > { %s31_s12 = sadd.s32 1, %s472_s10  ;;  %p398_p0 = scmp.ge.s32.totalorder %s476_s11, 1  ;;  %s476_s11 = sphi %s499_s11, %s12_s11   ;;  %s472_s10 = sphi %s497_s10, %s547_s10   ;;  %s468_s9 = sphi %s495_s9, %s546_s9  }
   0x3   : > { %p33_p1 = scmp.ge.s32.totalorder %s31_s12, 2  ;;  %p152_p2 = scmp.lt.s32.totalorder %s476_s11, 3 }
   0x5   : > { %s549_s12 = smov (%p33_p1, %s31_s12), 0  ;;  %p153_p3 = pnand %p398_p0, %p152_p2 }
   0x6   : > { %p185_p4 = scmp.lt.s32.totalorder (!%p153_p3), %s468_s9, 1 }
   0x7   : > { %156 = sbr.rel (%p153_p3) target bundleno = 233 (0xe9), region = 28 }
   0xc   : > { %v450_v0 = vld [vmem:[%s544_s1 + $0x18] sm:$0xff]   ;;  %v478_v1 = vmov 0.0   ;;  %v451_v2 = vld [vmem:[%s544_s1 + $0x10] sm:$0xff]   ;;  %vm479_vm0 = vmmov 0   ;;  %vm212_vm1 = vcmask 254976   ;;  %v452_v3 = vld [vmem:[%s544_s1 + $0x8] sm:$0xff]  }
   0xd   : > { %412 = vmatprep.subr.bf16.mxu0 %v478_v1  ;;  %420 = vmatprep.mubr.msk.bf16.mxu0 %vm479_vm0, %v478_v1  ;;  %213 = vst.msk [vmem:[#allocation2] sm:$0x3] %vm212_vm1, %v478_v1  ;;  %s551_s9 = smov (!%p185_p4, %s468_s9), 1  ;;  %v453_v4 = vld [vmem:[%s544_s1] sm:$0xff]   ;;  %vm248_vm2 = vcmask 523264  }
   0xe   : > { %413 = vmatpush3.bf16.msra.mxu0 %v450_v0  ;;  %s190_s23 = scalar_lea.vmem %s543_s0, %s551_s9  ;;  %s399_s24 = sshll.u32 %s551_s9, 1 }
   0xf   : > { %414 = vmatprep.subr.bf16.mxu0 %v478_v1  ;;  %v215_v5 = vld [vmem:[%s190_s23] sm:$0x1]  ;;  %s206_s27 = scalar_lea.vmem %s545_s2, %s399_s24 }
  0x12   : > { %415 = vmatpush3.bf16.msra.mxu0 %v451_v2 }
  0x13   : > { %416 = vmatprep.subr.bf16.mxu0 %v478_v1 }
  0x14   : > { %v214_v6 = vld [vmem:[#allocation2] sm:$0x3] }
  0x16   : > { %417 = vmatpush3.bf16.msra.mxu0 %v452_v3 }
  0x17   : > { %418 = vmatprep.subr.bf16.mxu0 %v478_v1 }
  0x1a   : > { %419 = vmatpush3.bf16.msra.mxu0 %v453_v4 }
  0x1d   : > { %421 = vmatmul.mubr.msk.bf16.vlgmr.msra.gmra.mxu0 %vm248_vm2, %v215_v5 }
  0xdd   : > { %v286_v7 = vpop.f32.mrf.mxu0 }
  0xde   : > { %v292_v8 = vadd.f32 %v286_v7, %v214_v6 }
  0xdf   : > { %v422_v9 = vpop.f32.mrf.mxu0 }
  0xe0   : > { %294 = vst.msk [vmem:[#allocation2] sm:$0x3] %vm212_vm1, %v292_v8 }
  0xe1   : > { %v289_v10 = vpop.f32.mrf.mxu0 }
  0xe3   : > { %v423_v11 = vpop.f32.mrf.mxu0 }
  0xe7   : > { %v298_v12 = vld [vmem:[#allocation2] sm:$0x3] }
  0xe8   : > { %299 = vst.msk [vmem:[%s206_s27] sm:$0x3] %vm212_vm1, %v298_v12 }
  0xe9 PF: > { %s12_s11 = sadd.s32 1, %s476_s11   ;;  %s546_s9 = smov %s472_s10 }
  0xea   : > { %p9_p5 = scmp.ge.s32.totalorder %s12_s11, 4   ;;  %s547_s10 = smov %s549_s12 }
  0xec   :  { %11 = sbr.rel (!%p9_p5) target bundleno = 2 (0x2), region = 69 }

</bundles_post_ra>
